<compile_context>
chip_gen: v7x
topology: tpu7x:2x2x1
jax: 0.10.0
libtpu: 0.0.40
codegen_flags: <defaults>
</compile_context>

<pallas_src>
import functools

import jax
import jax.numpy as jnp
from jax.experimental import pallas as pl
from jax.experimental.pallas import tpu as pltpu

TS_BLOCK = 4  # timesteps processed per grid step (T is padded to a multiple of this)


# -----------------------------------------------------------------------------
# Pallas kernels
# -----------------------------------------------------------------------------
def bilstm_kernel(pre_ref, whh_ref, len_ref, hall_ref, h_sc, c_sc,
                  *, seq_len, ts_block):
    """Fused bidirectional LSTM recurrence. Grid = (direction, time_block).

    pre_ref:  (1, TS, B, 4H) precomputed x@W_ih^T + b for this direction/time block
              (block is selected in reversed time order for the backward direction).
    whh_ref:  (1, H, 4H)     W_hh^T for this direction (bf16).
    len_ref:  (B, 1)         sequence lengths (int32).
    hall_ref: (1, TS, B, H)  per-timestep hidden output (original time order).
    h_sc/c_sc: (B, H) f32 VMEM scratch carrying the recurrence across grid steps.
    """
    d = pl.program_id(0)          # 0 = forward, 1 = backward
    j = pl.program_id(1)          # time-block index in processing order
    bsz, hdim = h_sc.shape

    @pl.when(j == 0)
    def _():
        h_sc[...] = jnp.zeros_like(h_sc)
        c_sc[...] = jnp.zeros_like(c_sc)

    whh = whh_ref[0]                                        # [H, 4H] bf16
    lens = jnp.broadcast_to(len_ref[...], (bsz, hdim))      # [B, H] int32

    def step(ts, carry):
        # position inside this block (backward walks the block in reverse)
        ts_local = (1 - d) * ts + d * (ts_block - 1 - ts)
        # processing-order step count and original timestep index
        r = j * ts_block + ts
        t_orig = (1 - d) * r + d * (seq_len - 1 - r)

        pre = pre_ref[0, ts_local]                          # [B, 4H] f32
        h = h_sc[...]
        c = c_sc[...]
        gates = pre + jnp.dot(h.astype(jnp.bfloat16), whh,
                              preferred_element_type=jnp.float32)

        # PyTorch gate order: i, f, g, o
        i_g = jax.nn.sigmoid(gates[:, 0 * hdim:1 * hdim])
        f_g = jax.nn.sigmoid(gates[:, 1 * hdim:2 * hdim])
        g_g = jnp.tanh(gates[:, 2 * hdim:3 * hdim])
        o_g = jax.nn.sigmoid(gates[:, 3 * hdim:4 * hdim])

        c_new = f_g * c + i_g * g_g
        h_new = o_g * jnp.tanh(c_new)

        # Freeze state at padded positions (packed-sequence semantics).
        valid = t_orig < lens                               # [B, H] bool
        c_sc[...] = jnp.where(valid, c_new, c)
        h_sc[...] = jnp.where(valid, h_new, h)
        hall_ref[0, ts_local] = h_sc[...]
        return carry

    jax.lax.fori_loop(0, ts_block, step, 0, unroll=True)


def head_kernel(x_ref, w1_ref, b1_ref, g_ref, be_ref, mu_ref, var_ref,
                w2_ref, b2_ref, o_ref):
    """fc1 -> BatchNorm1d(eval) -> ReLU -> (dropout=id) -> fc2 (lane-padded dims)."""
    h = jnp.dot(x_ref[...].astype(jnp.bfloat16), w1_ref[...],
                preferred_element_type=jnp.float32) + b1_ref[...]
    h = (h - mu_ref[...]) * jax.lax.rsqrt(var_ref[...] + 1e-5) * g_ref[...] + be_ref[...]
    h = jnp.maximum(h, 0.0)
    o_ref[...] = jnp.dot(h.astype(jnp.bfloat16), w2_ref[...],
                         preferred_element_type=jnp.float32) + b2_ref[...]


# -----------------------------------------------------------------------------
# Wrappers
# -----------------------------------------------------------------------------
def bilstm_layer(x_tm, lengths_col, wihT, whhT, b, *, ts_block):
    """One bidirectional LSTM layer over time-major x_tm [T, B, Din].

    Returns hall [2, T, B, H] (per-timestep hiddens, original time order, dir-major).
    """
    T, B, Din = x_tm.shape
    H = whhT.shape[1]
    TT = T // ts_block

    # Hoisted input projection for ALL timesteps & both directions (one big matmul,
    # bf16 operands, f32 accumulation) — removes ~2/3 of the MXU work from the
    # sequential recurrence and the W_ih block from the per-step VMEM working set.
    pre = jnp.einsum("tbd,zdh->ztbh", x_tm.astype(jnp.bfloat16), wihT,
                     preferred_element_type=jnp.float32)
    pre = pre + b[:, None, None, :]                          # [2, T, B, 4H] f32

    # Backward direction uses a time-reversed index_map (no HBM reversal copies).
    time_map = lambda d, j: (d, (1 - d) * j + d * (TT - 1 - j), 0, 0)

    kernel = functools.partial(bilstm_kernel, seq_len=T, ts_block=ts_block)
    hall = pl.pallas_call(
        kernel,
        out_shape=jax.ShapeDtypeStruct((2, T, B, H), jnp.float32),
        grid_spec=pltpu.PrefetchScalarGridSpec(
            num_scalar_prefetch=0,
            grid=(2, TT),
            in_specs=[
                pl.BlockSpec((1, ts_block, B, 4 * H), time_map),
                pl.BlockSpec((1, H, 4 * H), lambda d, j: (d, 0, 0)),
                pl.BlockSpec((B, 1), lambda d, j: (0, 0)),
            ],
            out_specs=pl.BlockSpec((1, ts_block, B, H), time_map),
            scratch_shapes=[pltpu.VMEM((B, H), jnp.float32),
                            pltpu.VMEM((B, H), jnp.float32)],
        ),
        compiler_params=pltpu.CompilerParams(
            # direction axis is parallel (v7x megacore), time is the sequential recurrence
            dimension_semantics=("parallel", "arbitrary")),
    )(pre, whhT, lengths_col)
    return hall


def mlp_head(combined_pad, p):
    Bp = combined_pad.shape[0]
    ncp = p["w2T_pad"].shape[1]
    return pl.pallas_call(
        head_kernel,
        out_shape=jax.ShapeDtypeStruct((Bp, ncp), jnp.float32),
    )(combined_pad, p["w1T_pad"], p["b1"], p["bn_gamma"], p["bn_beta"],
      p["bn_mean"], p["bn_var"], p["w2T_pad"], p["b2_pad"])


# -----------------------------------------------------------------------------
# Parameter init (deterministic, mirrors the PyTorch module's __init__ shapes)
# -----------------------------------------------------------------------------
def init_params(key, word_vocab, pos_vocab, ner_vocab, ent_vocab,
                emb_dim=200, pos_dim=30, ner_dim=30, ent_dim=30, position_dim=30,
                hidden_dim=256, num_layers=2, num_classes=10, max_len=60):
    half = hidden_dim // 2
    input_dim = emb_dim + pos_dim + ner_dim + 2 * position_dim
    keys = iter(jax.random.split(key, 64))

    def nrm(shape, scale=0.1):
        return scale * jax.random.normal(next(keys), shape, dtype=jnp.float32)

    p = {}
    p["word_emb"] = nrm((word_vocab, emb_dim)).at[0].set(0.0)            # padding_idx=0
    p["pos_emb"] = nrm((pos_vocab, pos_dim)).at[0].set(0.0)              # padding_idx=0
    p["ner_emb"] = nrm((ner_vocab, ner_dim)).at[0].set(0.0)              # padding_idx=0
    p["ent_emb"] = nrm((ent_vocab, ent_dim))
    p["position_emb"] = nrm((2 * max_len + 1, position_dim)).at[max_len].set(0.0)

    layers = []
    for layer in range(num_layers):
        din = input_dim if layer == 0 else hidden_dim
        wihT, whhT, bias = [], [], []
        for _ in range(2):                                   # fwd, bwd
            w_ih = nrm((4 * half, din))
            w_hh = nrm((4 * half, half))
            b_ih = nrm((4 * half,))
            b_hh = nrm((4 * half,))
            wihT.append(jnp.transpose(w_ih))                 # [din, 4H]
            whhT.append(jnp.transpose(w_hh))                 # [H, 4H]
            bias.append(b_ih + b_hh)                         # [4H]
        layers.append({
            "wihT": jnp.stack(wihT).astype(jnp.bfloat16),    # [2, din, 4H] bf16
            "whhT": jnp.stack(whhT).astype(jnp.bfloat16),    # [2, H, 4H]  bf16
            "b": jnp.stack(bias),                            # [2, 4H]     f32
        })
    p["lstm"] = layers

    comb_dim = hidden_dim + 2 * ent_dim                      # 316
    comb_pad = -(-comb_dim // 128) * 128                     # 384
    nc_pad = -(-num_classes // 128) * 128                    # 128
    w1 = nrm((hidden_dim, comb_dim))
    w2 = nrm((num_classes, hidden_dim))
    p["w1T_pad"] = jnp.pad(jnp.transpose(w1),
                           ((0, comb_pad - comb_dim), (0, 0))).astype(jnp.bfloat16)
    p["b1"] = nrm((hidden_dim,)).reshape(1, hidden_dim)
    p["w2T_pad"] = jnp.pad(jnp.transpose(w2),
                           ((0, 0), (0, nc_pad - num_classes))).astype(jnp.bfloat16)
    b2 = nrm((num_classes,)).reshape(1, num_classes)
    p["b2"] = b2                                             # unpadded (shape carrier)
    p["b2_pad"] = jnp.pad(b2, ((0, 0), (0, nc_pad - num_classes)))
    # BatchNorm1d defaults (eval mode)
    p["bn_gamma"] = jnp.ones((1, hidden_dim), jnp.float32)
    p["bn_beta"] = jnp.zeros((1, hidden_dim), jnp.float32)
    p["bn_mean"] = jnp.zeros((1, hidden_dim), jnp.float32)
    p["bn_var"] = jnp.ones((1, hidden_dim), jnp.float32)
    return p


# -----------------------------------------------------------------------------
# Forward pass
# -----------------------------------------------------------------------------
@jax.jit
def forward(params, token_ids, pos_ids, ner_ids, subj_positions, obj_positions,
            subj_type, obj_type, lengths):
    max_len = 60
    B, T = token_ids.shape
    H = params["lstm"][0]["whhT"].shape[1]

    # ---- embedding lookups (glue, plain JAX gathers) ----
    we = params["word_emb"][token_ids]                                   # [B,T,200]
    pe = params["pos_emb"][pos_ids]                                      # [B,T,30]
    ne = params["ner_emb"][ner_ids]                                      # [B,T,30]
    sp = params["position_emb"][jnp.clip(subj_positions + max_len, 0, 2 * max_len)]
    op = params["position_emb"][jnp.clip(obj_positions + max_len, 0, 2 * max_len)]
    st = params["ent_emb"][subj_type]                                    # [B,30]
    ot = params["ent_emb"][obj_type]                                     # [B,30]

    embeds = jnp.concatenate([we, pe, ne, sp, op], axis=2)               # [B,T,320]
    x = jnp.transpose(embeds, (1, 0, 2)).astype(jnp.float32)             # [T,B,320]

    # pad batch to a sublane multiple and time to a multiple of the per-step block;
    # padded sequences get length 0 (always masked -> state stays zero, sliced off).
    B_pad = -(-B // 8) * 8
    T_pad = -(-T // TS_BLOCK) * TS_BLOCK
    x = jnp.pad(x, ((0, T_pad - T), (0, B_pad - B), (0, 0)))
    lengths_col = jnp.pad(lengths.astype(jnp.int32), (0, B_pad - B))[:, None]  # [B_pad,1]

    layer_in = x
    hall = None
    for lyr in params["lstm"]:
        hall = bilstm_layer(layer_in, lengths_col, lyr["wihT"], lyr["whhT"],
                            lyr["b"], ts_block=TS_BLOCK)                 # [2,T_pad,B_pad,H]
        layer_in = jnp.concatenate([hall[0], hall[1]], axis=-1)          # [T_pad,B_pad,2H]
        # (inter-layer dropout is identity in eval mode)

    # hidden[-2:].transpose(0,1).view(B,-1) == [fwd_final | bwd_final] of last layer;
    # the mask freezes state past each length, so fwd final = hall[0,-1], bwd = hall[1,0].
    final_hidden = jnp.concatenate([hall[0, -1], hall[1, 0]], axis=-1)   # [B_pad, 2H]
    st_p = jnp.pad(st, ((0, B_pad - B), (0, 0)))
    ot_p = jnp.pad(ot, ((0, B_pad - B), (0, 0)))
    combined = jnp.concatenate([final_hidden, st_p, ot_p], axis=1)       # [B_pad, 316]
    comb_pad = params["w1T_pad"].shape[0]
    combined = jnp.pad(combined, ((0, 0), (0, comb_pad - combined.shape[1])))

    out_pad = mlp_head(combined.astype(jnp.float32), params)             # [B_pad, nc_pad]
    nc = params["b2"].shape[1]
    return out_pad[:B, :nc]                                              # [B, num_classes]


# -----------------------------------------------------------------------------
# Demo
# -----------------------------------------------------------------------------
if __name__ == "__main__":
    key = jax.random.PRNGKey(0)
    B, T = 2, 8
    word_vocab, pos_vocab, ner_vocab, ent_vocab = 100, 20, 12, 8

    pkey, *ikeys = jax.random.split(key, 9)
    params = init_params(pkey, word_vocab, pos_vocab, ner_vocab, ent_vocab)

    token_ids = jax.random.randint(ikeys[0], (B, T), 1, word_vocab, dtype=jnp.int32)
    pos_ids = jax.random.randint(ikeys[1], (B, T), 1, pos_vocab, dtype=jnp.int32)
    ner_ids = jax.random.randint(ikeys[2], (B, T), 1, ner_vocab, dtype=jnp.int32)
    subj_positions = jax.random.randint(ikeys[3], (B, T), -T, T, dtype=jnp.int32)
    obj_positions = jax.random.randint(ikeys[4], (B, T), -T, T, dtype=jnp.int32)
    subj_type = jax.random.randint(ikeys[5], (B,), 0, ent_vocab, dtype=jnp.int32)
    obj_type = jax.random.randint(ikeys[6], (B,), 0, ent_vocab, dtype=jnp.int32)
    lengths = jnp.array([T, T - 3], dtype=jnp.int32)

    out = forward(params, token_ids, pos_ids, ner_ids, subj_positions,
                  obj_positions, subj_type, obj_type, lengths)
    jax.block_until_ready(out)
    assert out.shape == (B, 10) and out.dtype == jnp.float32
    print("KERNEL_OK")
</pallas_src>

<mosaic_0001>
module attributes {stable_mosaic.version = 11 : i64} {
  func.func @bilstm_kernel(%arg0: i32, %arg1: i32, %arg2: memref<1x4x8x512xf32, #tpu.memory_space<vmem>>, %arg3: memref<1x128x512xbf16, #tpu.memory_space<vmem>>, %arg4: memref<8x1xi32, #tpu.memory_space<vmem>>, %arg5: memref<1x4x8x128xf32, #tpu.memory_space<vmem>>, %arg6: memref<8x128xf32, #tpu.memory_space<vmem>>, %arg7: memref<8x128xf32, #tpu.memory_space<vmem>>) attributes {dimension_semantics = [#tpu.dimension_semantics<parallel>, #tpu.dimension_semantics<arbitrary>], iteration_bounds = array<i64: 2, 2>, scalar_prefetch = 0 : i64, scratch_operands = 2 : i64, tpu.core_type = #tpu.core_type<tc>, window_params = [{transform_indices = @transform_0, window_bounds = array<i64: 1, 4, 8, 512>}, {transform_indices = @transform_1, window_bounds = array<i64: 1, 128, 512>}, {pipeline_mode = #tpu.pipeline_mode<synchronous>, transform_indices = @transform_2, window_bounds = array<i64: 8, 1>}, {transform_indices = @transform_3, window_bounds = array<i64: 1, 4, 8, 128>}]} {
    %c0_i32 = arith.constant 0 : i32
    %0 = arith.cmpi eq, %arg1, %c0_i32 : i32
    %1 = arith.extui %0 : i1 to i32
    %c0_i32_0 = arith.constant 0 : i32
    %2 = arith.cmpi ne, %1, %c0_i32_0 : i32
    scf.if %2 {
      %cst_104 = arith.constant 0.000000e+00 : f32
      %232 = vector.broadcast %cst_104 : f32 to vector<8x128xf32>
      %c0_105 = arith.constant 0 : index
      %c0_106 = arith.constant 0 : index
      %233 = vector.load %arg6[%c0_105, %c0_106] : memref<8x128xf32, #tpu.memory_space<vmem>>, vector<8x128xf32>
      tpu.vector_store %arg6[%c0_105, %c0_106], %232 {strides = array<i32>} : memref<8x128xf32, #tpu.memory_space<vmem>>, vector<8x128xf32>,
      %cst_107 = arith.constant 0.000000e+00 : f32
      %234 = vector.broadcast %cst_107 : f32 to vector<8x128xf32>
      %c0_108 = arith.constant 0 : index
      %c0_109 = arith.constant 0 : index
      %235 = vector.load %arg7[%c0_108, %c0_109] : memref<8x128xf32, #tpu.memory_space<vmem>>, vector<8x128xf32>
      tpu.vector_store %arg7[%c0_108, %c0_109], %234 {strides = array<i32>} : memref<8x128xf32, #tpu.memory_space<vmem>>, vector<8x128xf32>,
    } else {
    }
    %c0 = arith.constant 0 : index
    %c0_1 = arith.constant 0 : index
    %c0_2 = arith.constant 0 : index
    %3 = vector.load %arg3[%c0, %c0_1, %c0_2] : memref<1x128x512xbf16, #tpu.memory_space<vmem>>, vector<1x128x512xbf16>
    %4 = vector.shape_cast %3 : vector<1x128x512xbf16> to vector<128x512xbf16>
    %c0_3 = arith.constant 0 : index
    %c0_4 = arith.constant 0 : index
    %5 = vector.load %arg4[%c0_3, %c0_4] : memref<8x1xi32, #tpu.memory_space<vmem>>, vector<8x1xi32>
    %6 = vector.shape_cast %5 : vector<8x1xi32> to vector<8x1xi32>
    %7 = vector.broadcast %6 : vector<8x1xi32> to vector<8x128xi32>
    %c0_i32_5 = arith.constant 0 : i32
    %c1_i32 = arith.constant 1 : i32
    %8 = arith.subi %c1_i32, %arg0 : i32
    %9 = arith.muli %8, %c0_i32_5 : i32
    %c3_i32 = arith.constant 3 : i32
    %10 = arith.subi %c3_i32, %c0_i32_5 : i32
    %11 = arith.muli %arg0, %10 : i32
    %12 = arith.addi %9, %11 : i32
    %c4_i32 = arith.constant 4 : i32
    %13 = arith.muli %arg1, %c4_i32 : i32
    %14 = arith.addi %13, %c0_i32_5 : i32
    %c1_i32_6 = arith.constant 1 : i32
    %15 = arith.subi %c1_i32_6, %arg0 : i32
    %16 = arith.muli %15, %14 : i32
    %c7_i32 = arith.constant 7 : i32
    %17 = arith.subi %c7_i32, %14 : i32
    %18 = arith.muli %arg0, %17 : i32
    %19 = arith.addi %16, %18 : i32
    %c0_7 = arith.constant 0 : index
    %20 = arith.index_cast %12 : i32 to index
    %c0_8 = arith.constant 0 : index
    %c0_9 = arith.constant 0 : index
    %21 = vector.load %arg2[%c0_7, %20, %c0_8, %c0_9] : memref<1x4x8x512xf32, #tpu.memory_space<vmem>>, vector<1x1x8x512xf32>
    %22 = vector.shape_cast %21 : vector<1x1x8x512xf32> to vector<8x512xf32>
    %c0_10 = arith.constant 0 : index
    %c0_11 = arith.constant 0 : index
    %23 = vector.load %arg6[%c0_10, %c0_11] : memref<8x128xf32, #tpu.memory_space<vmem>>, vector<8x128xf32>
    %c0_12 = arith.constant 0 : index
    %c0_13 = arith.constant 0 : index
    %24 = vector.load %arg7[%c0_12, %c0_13] : memref<8x128xf32, #tpu.memory_space<vmem>>, vector<8x128xf32>
    %25 = arith.truncf %23 : vector<8x128xf32> to vector<8x128xbf16>
    %cst = arith.constant dense<0.000000e+00> : vector<8x512xf32>
    %26 = tpu.matmul %25, %4, %cst {dimension_numbers = #tpu.dot_dimension_numbers<[1], [0], [0], [1], [0, 0, 1, 1], [], []>} : vector<8x128xbf16>, vector<128x512xbf16>, vector<8x512xf32> -> vector<8x512xf32>
    %27 = arith.addf %22, %26 : vector<8x512xf32>
    %28 = vector.extract_strided_slice %27 {offsets = [0, 0], sizes = [8, 128], strides = [1, 1]} : vector<8x512xf32> to vector<8x128xf32>
    %29 = arith.negf %28 : vector<8x128xf32>
    %30 = math.exp %29 : vector<8x128xf32>
    %cst_14 = arith.constant 1.000000e+00 : f32
    %31 = vector.broadcast %cst_14 : f32 to vector<8x128xf32>
    %32 = arith.addf %31, %30 : vector<8x128xf32>
    %33 = arith.divf %31, %32 : vector<8x128xf32>
    %34 = vector.extract_strided_slice %27 {offsets = [0, 128], sizes = [8, 128], strides = [1, 1]} : vector<8x512xf32> to vector<8x128xf32>
    %35 = arith.negf %34 : vector<8x128xf32>
    %36 = math.exp %35 : vector<8x128xf32>
    %cst_15 = arith.constant 1.000000e+00 : f32
    %37 = vector.broadcast %cst_15 : f32 to vector<8x128xf32>
    %38 = arith.addf %37, %36 : vector<8x128xf32>
    %39 = arith.divf %37, %38 : vector<8x128xf32>
    %40 = vector.extract_strided_slice %27 {offsets = [0, 256], sizes = [8, 128], strides = [1, 1]} : vector<8x512xf32> to vector<8x128xf32>
    %41 = math.tanh %40 : vector<8x128xf32>
    %42 = vector.extract_strided_slice %27 {offsets = [0, 384], sizes = [8, 128], strides = [1, 1]} : vector<8x512xf32> to vector<8x128xf32>
    %43 = arith.negf %42 : vector<8x128xf32>
    %44 = math.exp %43 : vector<8x128xf32>
    %cst_16 = arith.constant 1.000000e+00 : f32
    %45 = vector.broadcast %cst_16 : f32 to vector<8x128xf32>
    %46 = arith.addf %45, %44 : vector<8x128xf32>
    %47 = arith.divf %45, %46 : vector<8x128xf32>
    %48 = arith.mulf %39, %24 : vector<8x128xf32>
    %49 = arith.mulf %33, %41 : vector<8x128xf32>
    %50 = arith.addf %48, %49 : vector<8x128xf32>
    %51 = math.tanh %50 : vector<8x128xf32>
    %52 = arith.mulf %47, %51 : vector<8x128xf32>
    %53 = vector.broadcast %19 : i32 to vector<8x128xi32>
    %54 = arith.cmpi slt, %53, %7 : vector<8x128xi32>
    %55 = arith.select %54, %50, %24 : vector<8x128xi1>, vector<8x128xf32>
    %c0_17 = arith.constant 0 : index
    %c0_18 = arith.constant 0 : index
    %56 = vector.load %arg7[%c0_17, %c0_18] : memref<8x128xf32, #tpu.memory_space<vmem>>, vector<8x128xf32>
    tpu.vector_store %arg7[%c0_17, %c0_18], %55 {strides = array<i32>} : memref<8x128xf32, #tpu.memory_space<vmem>>, vector<8x128xf32>,
    %57 = arith.select %54, %52, %23 : vector<8x128xi1>, vector<8x128xf32>
    %c0_19 = arith.constant 0 : index
    %c0_20 = arith.constant 0 : index
    %58 = vector.load %arg6[%c0_19, %c0_20] : memref<8x128xf32, #tpu.memory_space<vmem>>, vector<8x128xf32>
    tpu.vector_store %arg6[%c0_19, %c0_20], %57 {strides = array<i32>} : memref<8x128xf32, #tpu.memory_space<vmem>>, vector<8x128xf32>,
    %c0_21 = arith.constant 0 : index
    %c0_22 = arith.constant 0 : index
    %59 = vector.load %arg6[%c0_21, %c0_22] : memref<8x128xf32, #tpu.memory_space<vmem>>, vector<8x128xf32>
    %c0_23 = arith.constant 0 : index
    %60 = arith.index_cast %12 : i32 to index
    %c0_24 = arith.constant 0 : index
    %c0_25 = arith.constant 0 : index
    %61 = vector.load %arg5[%c0_23, %60, %c0_24, %c0_25] : memref<1x4x8x128xf32, #tpu.memory_space<vmem>>, vector<1x1x8x128xf32>
    %62 = vector.shape_cast %61 : vector<1x1x8x128xf32> to vector<8x128xf32>
    %63 = vector.shape_cast %59 : vector<8x128xf32> to vector<1x1x8x128xf32>
    tpu.vector_store %arg5[%c0_23, %60, %c0_24, %c0_25], %63 {strides = array<i32>} : memref<1x4x8x128xf32, #tpu.memory_space<vmem>>, vector<1x1x8x128xf32>,
    %c1_i32_26 = arith.constant 1 : i32
    %c1_i32_27 = arith.constant 1 : i32
    %64 = arith.subi %c1_i32_27, %arg0 : i32
    %65 = arith.muli %64, %c1_i32_26 : i32
    %c3_i32_28 = arith.constant 3 : i32
    %66 = arith.subi %c3_i32_28, %c1_i32_26 : i32
    %67 = arith.muli %arg0, %66 : i32
    %68 = arith.addi %65, %67 : i32
    %c4_i32_29 = arith.constant 4 : i32
    %69 = arith.muli %arg1, %c4_i32_29 : i32
    %70 = arith.addi %69, %c1_i32_26 : i32
    %c1_i32_30 = arith.constant 1 : i32
    %71 = arith.subi %c1_i32_30, %arg0 : i32
    %72 = arith.muli %71, %70 : i32
    %c7_i32_31 = arith.constant 7 : i32
    %73 = arith.subi %c7_i32_31, %70 : i32
    %74 = arith.muli %arg0, %73 : i32
    %75 = arith.addi %72, %74 : i32
    %c0_32 = arith.constant 0 : index
    %76 = arith.index_cast %68 : i32 to index
    %c0_33 = arith.constant 0 : index
    %c0_34 = arith.constant 0 : index
    %77 = vector.load %arg2[%c0_32, %76, %c0_33, %c0_34] : memref<1x4x8x512xf32, #tpu.memory_space<vmem>>, vector<1x1x8x512xf32>
    %78 = vector.shape_cast %77 : vector<1x1x8x512xf32> to vector<8x512xf32>
    %c0_35 = arith.constant 0 : index
    %c0_36 = arith.constant 0 : index
    %79 = vector.load %arg6[%c0_35, %c0_36] : memref<8x128xf32, #tpu.memory_space<vmem>>, vector<8x128xf32>
    %c0_37 = arith.constant 0 : index
    %c0_38 = arith.constant 0 : index
    %80 = vector.load %arg7[%c0_37, %c0_38] : memref<8x128xf32, #tpu.memory_space<vmem>>, vector<8x128xf32>
    %81 = arith.truncf %79 : vector<8x128xf32> to vector<8x128xbf16>
    %cst_39 = arith.constant dense<0.000000e+00> : vector<8x512xf32>
    %82 = tpu.matmul %81, %4, %cst_39 {dimension_numbers = #tpu.dot_dimension_numbers<[1], [0], [0], [1], [0, 0, 1, 1], [], []>} : vector<8x128xbf16>, vector<128x512xbf16>, vector<8x512xf32> -> vector<8x512xf32>
    %83 = arith.addf %78, %82 : vector<8x512xf32>
    %84 = vector.extract_strided_slice %83 {offsets = [0, 0], sizes = [8, 128], strides = [1, 1]} : vector<8x512xf32> to vector<8x128xf32>
    %85 = arith.negf %84 : vector<8x128xf32>
    %86 = math.exp %85 : vector<8x128xf32>
    %cst_40 = arith.constant 1.000000e+00 : f32
    %87 = vector.broadcast %cst_40 : f32 to vector<8x128xf32>
    %88 = arith.addf %87, %86 : vector<8x128xf32>
    %89 = arith.divf %87, %88 : vector<8x128xf32>
    %90 = vector.extract_strided_slice %83 {offsets = [0, 128], sizes = [8, 128], strides = [1, 1]} : vector<8x512xf32> to vector<8x128xf32>
    %91 = arith.negf %90 : vector<8x128xf32>
    %92 = math.exp %91 : vector<8x128xf32>
    %cst_41 = arith.constant 1.000000e+00 : f32
    %93 = vector.broadcast %cst_41 : f32 to vector<8x128xf32>
    %94 = arith.addf %93, %92 : vector<8x128xf32>
    %95 = arith.divf %93, %94 : vector<8x128xf32>
    %96 = vector.extract_strided_slice %83 {offsets = [0, 256], sizes = [8, 128], strides = [1, 1]} : vector<8x512xf32> to vector<8x128xf32>
    %97 = math.tanh %96 : vector<8x128xf32>
    %98 = vector.extract_strided_slice %83 {offsets = [0, 384], sizes = [8, 128], strides = [1, 1]} : vector<8x512xf32> to vector<8x128xf32>
    %99 = arith.negf %98 : vector<8x128xf32>
    %100 = math.exp %99 : vector<8x128xf32>
    %cst_42 = arith.constant 1.000000e+00 : f32
    %101 = vector.broadcast %cst_42 : f32 to vector<8x128xf32>
    %102 = arith.addf %101, %100 : vector<8x128xf32>
    %103 = arith.divf %101, %102 : vector<8x128xf32>
    %104 = arith.mulf %95, %80 : vector<8x128xf32>
    %105 = arith.mulf %89, %97 : vector<8x128xf32>
    %106 = arith.addf %104, %105 : vector<8x128xf32>
    %107 = math.tanh %106 : vector<8x128xf32>
    %108 = arith.mulf %103, %107 : vector<8x128xf32>
    %109 = vector.broadcast %75 : i32 to vector<8x128xi32>
    %110 = arith.cmpi slt, %109, %7 : vector<8x128xi32>
    %111 = arith.select %110, %106, %80 : vector<8x128xi1>, vector<8x128xf32>
    %c0_43 = arith.constant 0 : index
    %c0_44 = arith.constant 0 : index
    %112 = vector.load %arg7[%c0_43, %c0_44] : memref<8x128xf32, #tpu.memory_space<vmem>>, vector<8x128xf32>
    tpu.vector_store %arg7[%c0_43, %c0_44], %111 {strides = array<i32>} : memref<8x128xf32, #tpu.memory_space<vmem>>, vector<8x128xf32>,
    %113 = arith.select %110, %108, %79 : vector<8x128xi1>, vector<8x128xf32>
    %c0_45 = arith.constant 0 : index
    %c0_46 = arith.constant 0 : index
    %114 = vector.load %arg6[%c0_45, %c0_46] : memref<8x128xf32, #tpu.memory_space<vmem>>, vector<8x128xf32>
    tpu.vector_store %arg6[%c0_45, %c0_46], %113 {strides = array<i32>} : memref<8x128xf32, #tpu.memory_space<vmem>>, vector<8x128xf32>,
    %c0_47 = arith.constant 0 : index
    %c0_48 = arith.constant 0 : index
    %115 = vector.load %arg6[%c0_47, %c0_48] : memref<8x128xf32, #tpu.memory_space<vmem>>, vector<8x128xf32>
    %c0_49 = arith.constant 0 : index
    %116 = arith.index_cast %68 : i32 to index
    %c0_50 = arith.constant 0 : index
    %c0_51 = arith.constant 0 : index
    %117 = vector.load %arg5[%c0_49, %116, %c0_50, %c0_51] : memref<1x4x8x128xf32, #tpu.memory_space<vmem>>, vector<1x1x8x128xf32>
    %118 = vector.shape_cast %117 : vector<1x1x8x128xf32> to vector<8x128xf32>
    %119 = vector.shape_cast %115 : vector<8x128xf32> to vector<1x1x8x128xf32>
    tpu.vector_store %arg5[%c0_49, %116, %c0_50, %c0_51], %119 {strides = array<i32>} : memref<1x4x8x128xf32, #tpu.memory_space<vmem>>, vector<1x1x8x128xf32>,
    %c2_i32 = arith.constant 2 : i32
    %c1_i32_52 = arith.constant 1 : i32
    %120 = arith.subi %c1_i32_52, %arg0 : i32
    %121 = arith.muli %120, %c2_i32 : i32
    %c3_i32_53 = arith.constant 3 : i32
    %122 = arith.subi %c3_i32_53, %c2_i32 : i32
    %123 = arith.muli %arg0, %122 : i32
    %124 = arith.addi %121, %123 : i32
    %c4_i32_54 = arith.constant 4 : i32
    %125 = arith.muli %arg1, %c4_i32_54 : i32
    %126 = arith.addi %125, %c2_i32 : i32
    %c1_i32_55 = arith.constant 1 : i32
    %127 = arith.subi %c1_i32_55, %arg0 : i32
    %128 = arith.muli %127, %126 : i32
    %c7_i32_56 = arith.constant 7 : i32
    %129 = arith.subi %c7_i32_56, %126 : i32
    %130 = arith.muli %arg0, %129 : i32
    %131 = arith.addi %128, %130 : i32
    %c0_57 = arith.constant 0 : index
    %132 = arith.index_cast %124 : i32 to index
    %c0_58 = arith.constant 0 : index
    %c0_59 = arith.constant 0 : index
    %133 = vector.load %arg2[%c0_57, %132, %c0_58, %c0_59] : memref<1x4x8x512xf32, #tpu.memory_space<vmem>>, vector<1x1x8x512xf32>
    %134 = vector.shape_cast %133 : vector<1x1x8x512xf32> to vector<8x512xf32>
    %c0_60 = arith.constant 0 : index
    %c0_61 = arith.constant 0 : index
    %135 = vector.load %arg6[%c0_60, %c0_61] : memref<8x128xf32, #tpu.memory_space<vmem>>, vector<8x128xf32>
    %c0_62 = arith.constant 0 : index
    %c0_63 = arith.constant 0 : index
    %136 = vector.load %arg7[%c0_62, %c0_63] : memref<8x128xf32, #tpu.memory_space<vmem>>, vector<8x128xf32>
    %137 = arith.truncf %135 : vector<8x128xf32> to vector<8x128xbf16>
    %cst_64 = arith.constant dense<0.000000e+00> : vector<8x512xf32>
    %138 = tpu.matmul %137, %4, %cst_64 {dimension_numbers = #tpu.dot_dimension_numbers<[1], [0], [0], [1], [0, 0, 1, 1], [], []>} : vector<8x128xbf16>, vector<128x512xbf16>, vector<8x512xf32> -> vector<8x512xf32>
    %139 = arith.addf %134, %138 : vector<8x512xf32>
    %140 = vector.extract_strided_slice %139 {offsets = [0, 0], sizes = [8, 128], strides = [1, 1]} : vector<8x512xf32> to vector<8x128xf32>
    %141 = arith.negf %140 : vector<8x128xf32>
    %142 = math.exp %141 : vector<8x128xf32>
    %cst_65 = arith.constant 1.000000e+00 : f32
    %143 = vector.broadcast %cst_65 : f32 to vector<8x128xf32>
    %144 = arith.addf %143, %142 : vector<8x128xf32>
    %145 = arith.divf %143, %144 : vector<8x128xf32>
    %146 = vector.extract_strided_slice %139 {offsets = [0, 128], sizes = [8, 128], strides = [1, 1]} : vector<8x512xf32> to vector<8x128xf32>
    %147 = arith.negf %146 : vector<8x128xf32>
    %148 = math.exp %147 : vector<8x128xf32>
    %cst_66 = arith.constant 1.000000e+00 : f32
    %149 = vector.broadcast %cst_66 : f32 to vector<8x128xf32>
    %150 = arith.addf %149, %148 : vector<8x128xf32>
    %151 = arith.divf %149, %150 : vector<8x128xf32>
    %152 = vector.extract_strided_slice %139 {offsets = [0, 256], sizes = [8, 128], strides = [1, 1]} : vector<8x512xf32> to vector<8x128xf32>
    %153 = math.tanh %152 : vector<8x128xf32>
    %154 = vector.extract_strided_slice %139 {offsets = [0, 384], sizes = [8, 128], strides = [1, 1]} : vector<8x512xf32> to vector<8x128xf32>
    %155 = arith.negf %154 : vector<8x128xf32>
    %156 = math.exp %155 : vector<8x128xf32>
    %cst_67 = arith.constant 1.000000e+00 : f32
    %157 = vector.broadcast %cst_67 : f32 to vector<8x128xf32>
    %158 = arith.addf %157, %156 : vector<8x128xf32>
    %159 = arith.divf %157, %158 : vector<8x128xf32>
    %160 = arith.mulf %151, %136 : vector<8x128xf32>
    %161 = arith.mulf %145, %153 : vector<8x128xf32>
    %162 = arith.addf %160, %161 : vector<8x128xf32>
    %163 = math.tanh %162 : vector<8x128xf32>
    %164 = arith.mulf %159, %163 : vector<8x128xf32>
    %165 = vector.broadcast %131 : i32 to vector<8x128xi32>
    %166 = arith.cmpi slt, %165, %7 : vector<8x128xi32>
    %167 = arith.select %166, %162, %136 : vector<8x128xi1>, vector<8x128xf32>
    %c0_68 = arith.constant 0 : index
    %c0_69 = arith.constant 0 : index
    %168 = vector.load %arg7[%c0_68, %c0_69] : memref<8x128xf32, #tpu.memory_space<vmem>>, vector<8x128xf32>
    tpu.vector_store %arg7[%c0_68, %c0_69], %167 {strides = array<i32>} : memref<8x128xf32, #tpu.memory_space<vmem>>, vector<8x128xf32>,
    %169 = arith.select %166, %164, %135 : vector<8x128xi1>, vector<8x128xf32>
    %c0_70 = arith.constant 0 : index
    %c0_71 = arith.constant 0 : index
    %170 = vector.load %arg6[%c0_70, %c0_71] : memref<8x128xf32, #tpu.memory_space<vmem>>, vector<8x128xf32>
    tpu.vector_store %arg6[%c0_70, %c0_71], %169 {strides = array<i32>} : memref<8x128xf32, #tpu.memory_space<vmem>>, vector<8x128xf32>,
    %c0_72 = arith.constant 0 : index
    %c0_73 = arith.constant 0 : index
    %171 = vector.load %arg6[%c0_72, %c0_73] : memref<8x128xf32, #tpu.memory_space<vmem>>, vector<8x128xf32>
    %c0_74 = arith.constant 0 : index
    %172 = arith.index_cast %124 : i32 to index
    %c0_75 = arith.constant 0 : index
    %c0_76 = arith.constant 0 : index
    %173 = vector.load %arg5[%c0_74, %172, %c0_75, %c0_76] : memref<1x4x8x128xf32, #tpu.memory_space<vmem>>, vector<1x1x8x128xf32>
    %174 = vector.shape_cast %173 : vector<1x1x8x128xf32> to vector<8x128xf32>
    %175 = vector.shape_cast %171 : vector<8x128xf32> to vector<1x1x8x128xf32>
    tpu.vector_store %arg5[%c0_74, %172, %c0_75, %c0_76], %175 {strides = array<i32>} : memref<1x4x8x128xf32, #tpu.memory_space<vmem>>, vector<1x1x8x128xf32>,
    %c3_i32_77 = arith.constant 3 : i32
    %c1_i32_78 = arith.constant 1 : i32
    %176 = arith.subi %c1_i32_78, %arg0 : i32
    %177 = arith.muli %176, %c3_i32_77 : i32
    %c3_i32_79 = arith.constant 3 : i32
    %178 = arith.subi %c3_i32_79, %c3_i32_77 : i32
    %179 = arith.muli %arg0, %178 : i32
    %180 = arith.addi %177, %179 : i32
    %c4_i32_80 = arith.constant 4 : i32
    %181 = arith.muli %arg1, %c4_i32_80 : i32
    %182 = arith.addi %181, %c3_i32_77 : i32
    %c1_i32_81 = arith.constant 1 : i32
    %183 = arith.subi %c1_i32_81, %arg0 : i32
    %184 = arith.muli %183, %182 : i32
    %c7_i32_82 = arith.constant 7 : i32
    %185 = arith.subi %c7_i32_82, %182 : i32
    %186 = arith.muli %arg0, %185 : i32
    %187 = arith.addi %184, %186 : i32
    %c0_83 = arith.constant 0 : index
    %188 = arith.index_cast %180 : i32 to index
    %c0_84 = arith.constant 0 : index
    %c0_85 = arith.constant 0 : index
    %189 = vector.load %arg2[%c0_83, %188, %c0_84, %c0_85] : memref<1x4x8x512xf32, #tpu.memory_space<vmem>>, vector<1x1x8x512xf32>
    %190 = vector.shape_cast %189 : vector<1x1x8x512xf32> to vector<8x512xf32>
    %c0_86 = arith.constant 0 : index
    %c0_87 = arith.constant 0 : index
    %191 = vector.load %arg6[%c0_86, %c0_87] : memref<8x128xf32, #tpu.memory_space<vmem>>, vector<8x128xf32>
    %c0_88 = arith.constant 0 : index
    %c0_89 = arith.constant 0 : index
    %192 = vector.load %arg7[%c0_88, %c0_89] : memref<8x128xf32, #tpu.memory_space<vmem>>, vector<8x128xf32>
    %193 = arith.truncf %191 : vector<8x128xf32> to vector<8x128xbf16>
    %cst_90 = arith.constant dense<0.000000e+00> : vector<8x512xf32>
    %194 = tpu.matmul %193, %4, %cst_90 {dimension_numbers = #tpu.dot_dimension_numbers<[1], [0], [0], [1], [0, 0, 1, 1], [], []>} : vector<8x128xbf16>, vector<128x512xbf16>, vector<8x512xf32> -> vector<8x512xf32>
    %195 = arith.addf %190, %194 : vector<8x512xf32>
    %196 = vector.extract_strided_slice %195 {offsets = [0, 0], sizes = [8, 128], strides = [1, 1]} : vector<8x512xf32> to vector<8x128xf32>
    %197 = arith.negf %196 : vector<8x128xf32>
    %198 = math.exp %197 : vector<8x128xf32>
    %cst_91 = arith.constant 1.000000e+00 : f32
    %199 = vector.broadcast %cst_91 : f32 to vector<8x128xf32>
    %200 = arith.addf %199, %198 : vector<8x128xf32>
    %201 = arith.divf %199, %200 : vector<8x128xf32>
    %202 = vector.extract_strided_slice %195 {offsets = [0, 128], sizes = [8, 128], strides = [1, 1]} : vector<8x512xf32> to vector<8x128xf32>
    %203 = arith.negf %202 : vector<8x128xf32>
    %204 = math.exp %203 : vector<8x128xf32>
    %cst_92 = arith.constant 1.000000e+00 : f32
    %205 = vector.broadcast %cst_92 : f32 to vector<8x128xf32>
    %206 = arith.addf %205, %204 : vector<8x128xf32>
    %207 = arith.divf %205, %206 : vector<8x128xf32>
    %208 = vector.extract_strided_slice %195 {offsets = [0, 256], sizes = [8, 128], strides = [1, 1]} : vector<8x512xf32> to vector<8x128xf32>
    %209 = math.tanh %208 : vector<8x128xf32>
    %210 = vector.extract_strided_slice %195 {offsets = [0, 384], sizes = [8, 128], strides = [1, 1]} : vector<8x512xf32> to vector<8x128xf32>
    %211 = arith.negf %210 : vector<8x128xf32>
    %212 = math.exp %211 : vector<8x128xf32>
    %cst_93 = arith.constant 1.000000e+00 : f32
    %213 = vector.broadcast %cst_93 : f32 to vector<8x128xf32>
    %214 = arith.addf %213, %212 : vector<8x128xf32>
    %215 = arith.divf %213, %214 : vector<8x128xf32>
    %216 = arith.mulf %207, %192 : vector<8x128xf32>
    %217 = arith.mulf %201, %209 : vector<8x128xf32>
    %218 = arith.addf %216, %217 : vector<8x128xf32>
    %219 = math.tanh %218 : vector<8x128xf32>
    %220 = arith.mulf %215, %219 : vector<8x128xf32>
    %221 = vector.broadcast %187 : i32 to vector<8x128xi32>
    %222 = arith.cmpi slt, %221, %7 : vector<8x128xi32>
    %223 = arith.select %222, %218, %192 : vector<8x128xi1>, vector<8x128xf32>
    %c0_94 = arith.constant 0 : index
    %c0_95 = arith.constant 0 : index
    %224 = vector.load %arg7[%c0_94, %c0_95] : memref<8x128xf32, #tpu.memory_space<vmem>>, vector<8x128xf32>
    tpu.vector_store %arg7[%c0_94, %c0_95], %223 {strides = array<i32>} : memref<8x128xf32, #tpu.memory_space<vmem>>, vector<8x128xf32>,
    %225 = arith.select %222, %220, %191 : vector<8x128xi1>, vector<8x128xf32>
    %c0_96 = arith.constant 0 : index
    %c0_97 = arith.constant 0 : index
    %226 = vector.load %arg6[%c0_96, %c0_97] : memref<8x128xf32, #tpu.memory_space<vmem>>, vector<8x128xf32>
    tpu.vector_store %arg6[%c0_96, %c0_97], %225 {strides = array<i32>} : memref<8x128xf32, #tpu.memory_space<vmem>>, vector<8x128xf32>,
    %c0_98 = arith.constant 0 : index
    %c0_99 = arith.constant 0 : index
    %227 = vector.load %arg6[%c0_98, %c0_99] : memref<8x128xf32, #tpu.memory_space<vmem>>, vector<8x128xf32>
    %c0_100 = arith.constant 0 : index
    %228 = arith.index_cast %180 : i32 to index
    %c0_101 = arith.constant 0 : index
    %c0_102 = arith.constant 0 : index
    %229 = vector.load %arg5[%c0_100, %228, %c0_101, %c0_102] : memref<1x4x8x128xf32, #tpu.memory_space<vmem>>, vector<1x1x8x128xf32>
    %230 = vector.shape_cast %229 : vector<1x1x8x128xf32> to vector<8x128xf32>
    %231 = vector.shape_cast %227 : vector<8x128xf32> to vector<1x1x8x128xf32>
    tpu.vector_store %arg5[%c0_100, %228, %c0_101, %c0_102], %231 {strides = array<i32>} : memref<1x4x8x128xf32, #tpu.memory_space<vmem>>, vector<1x1x8x128xf32>,
    %c4_i32_103 = arith.constant 4 : i32
    return
  }
  func.func @transform_0(%arg0: i32, %arg1: i32) -> (i32, i32, i32, i32) {
    %c1_i32 = arith.constant 1 : i32
    %0 = arith.subi %c1_i32, %arg0 : i32
    %1 = arith.muli %0, %arg1 : i32
    %c1_i32_0 = arith.constant 1 : i32
    %2 = arith.subi %c1_i32_0, %arg1 : i32
    %3 = arith.muli %arg0, %2 : i32
    %4 = arith.addi %1, %3 : i32
    %c0_i32 = arith.constant 0 : i32
    %c0_i32_1 = arith.constant 0 : i32
    %c0_i32_2 = arith.constant 0 : i32
    return %arg0, %4, %c0_i32, %c0_i32_1 : i32, i32, i32, i32
  }
  func.func @transform_1(%arg0: i32, %arg1: i32) -> (i32, i32, i32) {
    %c0_i32 = arith.constant 0 : i32
    %c0_i32_0 = arith.constant 0 : i32
    %c0_i32_1 = arith.constant 0 : i32
    return %arg0, %c0_i32, %c0_i32_0 : i32, i32, i32
  }
  func.func @transform_2(%arg0: i32, %arg1: i32) -> (i32, i32) {
    %c0_i32 = arith.constant 0 : i32
    %c0_i32_0 = arith.constant 0 : i32
    %c0_i32_1 = arith.constant 0 : i32
    return %c0_i32, %c0_i32_0 : i32, i32
  }
  func.func @transform_3(%arg0: i32, %arg1: i32) -> (i32, i32, i32, i32) {
    %c1_i32 = arith.constant 1 : i32
    %0 = arith.subi %c1_i32, %arg0 : i32
    %1 = arith.muli %0, %arg1 : i32
    %c1_i32_0 = arith.constant 1 : i32
    %2 = arith.subi %c1_i32_0, %arg1 : i32
    %3 = arith.muli %arg0, %2 : i32
    %4 = arith.addi %1, %3 : i32
    %c0_i32 = arith.constant 0 : i32
    %c0_i32_1 = arith.constant 0 : i32
    %c0_i32_2 = arith.constant 0 : i32
    return %arg0, %4, %c0_i32, %c0_i32_1 : i32, i32, i32, i32
  }
}

module attributes {stable_mosaic.version = 11 : i64} {
  func.func @head_kernel(%arg0: memref<8x384xf32, #tpu.memory_space<vmem>>, %arg1: memref<384x256xbf16, #tpu.memory_space<vmem>>, %arg2: memref<1x256xf32, #tpu.memory_space<vmem>>, %arg3: memref<1x256xf32, #tpu.memory_space<vmem>>, %arg4: memref<1x256xf32, #tpu.memory_space<vmem>>, %arg5: memref<1x256xf32, #tpu.memory_space<vmem>>, %arg6: memref<1x256xf32, #tpu.memory_space<vmem>>, %arg7: memref<256x128xbf16, #tpu.memory_space<vmem>>, %arg8: memref<1x128xf32, #tpu.memory_space<vmem>>, %arg9: memref<8x128xf32, #tpu.memory_space<vmem>>) attributes {dimension_semantics = [], scalar_prefetch = 0 : i64, scratch_operands = 0 : i64, tpu.core_type = #tpu.core_type<tc>} {
    %c0 = arith.constant 0 : index
    %c0_0 = arith.constant 0 : index
    %0 = vector.load %arg0[%c0, %c0_0] : memref<8x384xf32, #tpu.memory_space<vmem>>, vector<8x384xf32>
    %1 = arith.truncf %0 : vector<8x384xf32> to vector<8x384xbf16>
    %c0_1 = arith.constant 0 : index
    %c0_2 = arith.constant 0 : index
    %2 = vector.load %arg1[%c0_1, %c0_2] : memref<384x256xbf16, #tpu.memory_space<vmem>>, vector<384x256xbf16>
    %cst = arith.constant dense<0.000000e+00> : vector<8x256xf32>
    %3 = tpu.matmul %1, %2, %cst {dimension_numbers = #tpu.dot_dimension_numbers<[1], [0], [0], [1], [0, 0, 1, 1], [], []>} : vector<8x384xbf16>, vector<384x256xbf16>, vector<8x256xf32> -> vector<8x256xf32>
    %c0_3 = arith.constant 0 : index
    %c0_4 = arith.constant 0 : index
    %4 = vector.load %arg2[%c0_3, %c0_4] : memref<1x256xf32, #tpu.memory_space<vmem>>, vector<1x256xf32>
    %5 = vector.broadcast %4 : vector<1x256xf32> to vector<8x256xf32>
    %6 = arith.addf %3, %5 : vector<8x256xf32>
    %c0_5 = arith.constant 0 : index
    %c0_6 = arith.constant 0 : index
    %7 = vector.load %arg5[%c0_5, %c0_6] : memref<1x256xf32, #tpu.memory_space<vmem>>, vector<1x256xf32>
    %8 = vector.broadcast %7 : vector<1x256xf32> to vector<8x256xf32>
    %9 = arith.subf %6, %8 : vector<8x256xf32>
    %c0_7 = arith.constant 0 : index
    %c0_8 = arith.constant 0 : index
    %10 = vector.load %arg6[%c0_7, %c0_8] : memref<1x256xf32, #tpu.memory_space<vmem>>, vector<1x256xf32>
    %cst_9 = arith.constant 9.99999974E-6 : f32
    %11 = vector.broadcast %cst_9 : f32 to vector<1x256xf32>
    %12 = arith.addf %10, %11 : vector<1x256xf32>
    %13 = math.rsqrt %12 : vector<1x256xf32>
    %14 = vector.broadcast %13 : vector<1x256xf32> to vector<8x256xf32>
    %15 = arith.mulf %9, %14 : vector<8x256xf32>
    %c0_10 = arith.constant 0 : index
    %c0_11 = arith.constant 0 : index
    %16 = vector.load %arg3[%c0_10, %c0_11] : memref<1x256xf32, #tpu.memory_space<vmem>>, vector<1x256xf32>
    %17 = vector.broadcast %16 : vector<1x256xf32> to vector<8x256xf32>
    %18 = arith.mulf %15, %17 : vector<8x256xf32>
    %c0_12 = arith.constant 0 : index
    %c0_13 = arith.constant 0 : index
    %19 = vector.load %arg4[%c0_12, %c0_13] : memref<1x256xf32, #tpu.memory_space<vmem>>, vector<1x256xf32>
    %20 = vector.broadcast %19 : vector<1x256xf32> to vector<8x256xf32>
    %21 = arith.addf %18, %20 : vector<8x256xf32>
    %cst_14 = arith.constant 0.000000e+00 : f32
    %22 = vector.broadcast %cst_14 : f32 to vector<8x256xf32>
    %23 = arith.maximumf %21, %22 : vector<8x256xf32>
    %24 = arith.truncf %23 : vector<8x256xf32> to vector<8x256xbf16>
    %c0_15 = arith.constant 0 : index
    %c0_16 = arith.constant 0 : index
    %25 = vector.load %arg7[%c0_15, %c0_16] : memref<256x128xbf16, #tpu.memory_space<vmem>>, vector<256x128xbf16>
    %cst_17 = arith.constant dense<0.000000e+00> : vector<8x128xf32>
    %26 = tpu.matmul %24, %25, %cst_17 {dimension_numbers = #tpu.dot_dimension_numbers<[1], [0], [0], [1], [0, 0, 1, 1], [], []>} : vector<8x256xbf16>, vector<256x128xbf16>, vector<8x128xf32> -> vector<8x128xf32>
    %c0_18 = arith.constant 0 : index
    %c0_19 = arith.constant 0 : index
    %27 = vector.load %arg8[%c0_18, %c0_19] : memref<1x128xf32, #tpu.memory_space<vmem>>, vector<1x128xf32>
    %28 = vector.broadcast %27 : vector<1x128xf32> to vector<8x128xf32>
    %29 = arith.addf %26, %28 : vector<8x128xf32>
    %c0_20 = arith.constant 0 : index
    %c0_21 = arith.constant 0 : index
    %30 = vector.load %arg9[%c0_20, %c0_21] : memref<8x128xf32, #tpu.memory_space<vmem>>, vector<8x128xf32>
    tpu.vector_store %arg9[%c0_20, %c0_21], %29 {strides = array<i32>} : memref<8x128xf32, #tpu.memory_space<vmem>>, vector<8x128xf32>,
    return
  }
}

</mosaic_0001>

<bundles_post_ra>
// kernel: forward.3
= control target key start
LH: loop header
LB: loop body
LE: loop exit
PB: predicated region body
PF: predicated region fallthrough
CT: control target
= control target key end

     0   :  { %s1485_s12 = smov 0   ;;  %s1487_s13 = smov 0   ;;  %s1896_s0 = inlined_call_operand.vmem [shape: f32[2,8,8,512], index: 0, kind: input, shape index: {}]   ;;  %s1897_s1 = inlined_call_operand.vmem [shape: bf16[2,128,512], index: 1, kind: input, shape index: {}]   ;;  %s1898_s2 = inlined_call_operand.vmem [shape: s32[8,1], index: 2, kind: input, shape index: {}]   ;;  %s1899_s3 = inlined_call_operand.vmem [shape: f32[2,8,8,128], index: 3, kind: output, shape index: {}]  }
   0x1   :  { %s1489_s14 = smov 0   ;;  %s1491_s15 = smov 0  }
   0x2   :  { %s1493_s16 = smov 0  }
   0x3 LB: > { %s22_s17 = sadd.s32 1, %s1453_s14  ;;  %s25_s18 = sadd.s32 1, %s1457_s15  ;;  %s1461_s16 = sphi %s1493_s16, %s13_s16   ;;  %s1457_s15 = sphi %s1491_s15, %s1903_s15   ;;  %s1453_s14 = sphi %s1489_s14, %s1902_s14   ;;  %s1449_s13 = sphi %s1487_s13, %s1901_s13   ;;  %s1445_s12 = sphi %s1485_s12, %s1900_s12  }
   0x4   : > { %p23_p0 = scmp.ge.s32.totalorder %s22_s17, 2  ;;  %p1191_p1 = scmp.ge.s32.totalorder %s1461_s16, 1 }
   0x5   : > { %p199_p2 = scmp.lt.s32.totalorder %s1461_s16, 5 }
   0x6   : > { %s1905_s17 = smov (%p23_p0, %s22_s17), 0  ;;  %s1907_s18 = smov (!%p23_p0, %s25_s18), %s1457_s15 }
   0x7   : > { %p200_p3 = pnand %p1191_p1, %p199_p2  ;;  %p27_p4 = scmp.ge.s32.totalorder %s1907_s18, 2 }
   0x8   : > { %s1520_s19 = ssub.s32 (!%p200_p3), 1, %s1449_s13  ;;  %s249_s20 = ssub.s32 (!%p200_p3), 1, %s1445_s12 }
   0x9   : > { %s1909_s18 = smov (%p27_p4, %s1907_s18), 0  ;;  %203 = sbr.rel (%p200_p3) target bundleno = 1101 (0x44d), region = 32 }
   0xa   : > { %s248_s21 = smul.u32 (!%p200_p3), %s1445_s12, %s1520_s19  ;;  %p253_p5 = scmp.lt.s32.totalorder (!%p200_p3), %s1449_s13, 1 }
   0xb   : > { %s250_s22 = smul.u32 (!%p200_p3), %s1449_s13, %s249_s20  ;;  %p1201_p7 = scmp.ne.s32.totalorder (!%p200_p3), %s1445_s12, 0 }
   0xd   : > { %s251_s24 = sadd.s32 (!%p200_p3), %s250_s22, %s248_s21 }
   0xe   : > { %s1192_s25 = sshll.u32 (!%p200_p3), %s251_s24, 2 }
   0xf   : > { %p255_p6 = scmp.lt.s32.totalorder (!%p200_p3), %s1192_s25, 7 }
  0x10   : > { %s254_s23 = scalar_select %p253_p5, %s1449_s13, 1 }
  0x11   : > { %s1911_s25 = smov (!%p255_p6, %s1192_s25), 7  ;;  %297 = sbr.rel (%p1201_p7) target bundleno = 24 (0x18), region = 36 }
  0x12   : > { %s1194_s26 = sshll.u32 %s254_s23, 5  ;;  %s1263_s27 = sshll.u32 %s254_s23, 8  ;;  %v1463_v0 = vmov (!%p1201_p7), 0.0  }
  0x13   : > { %s1531_s30 = scalar_lea.vmem %s1897_s1, %s1263_s27  ;;  %s1199_s4 = sshll.u32 %s254_s23, 3  ;;  %298 = vst [vmem:[#allocation2] sm:$0xff] (!%p1201_p7), %v1463_v0  ;;  %299 = vst [vmem:[#allocation3] sm:$0xff] (!%p1201_p7), %v1463_v0 }
  0x14   : > { %s1193_s5 = sshll.u32 %s1911_s25, 2  ;;  %s284_s6 = sadd.s32 %s1199_s4, %s1911_s25 }
  0x15   : > { %s259_s7 = sadd.s32 %s1194_s26, %s1193_s5  ;;  %s1200_s8 = sshll.u32 %s284_s6, 3 }
  0x16   : > { %s1195_s9 = sshll.u32 %s259_s7, 3  ;;  %s1536_s20 = scalar_lea.vmem %s1899_s3, %s1200_s8 }
  0x17   : > { %s1541_s24 = scalar_lea.vmem %s1896_s0, %s1195_s9 }
  0x18 PF: > { %v1545_v1 = vld [vmem:[%s1531_s30 + $0x4] ss:$16 sps:$4 sm:$0xff]   ;;  %v1548_v2 = vld [vmem:[%s1531_s30] ss:$16 sps:$4 sm:$0xff]   ;;  %v1464_v3 = vmov 0   ;;  %s1719_s26 = sshll.u32 %s1445_s12, 2 }
  0x19   : > { %545 = vmatprep.mubr.bf16.mxu0 %v1464_v3  ;;  %586 = vmatprep.mubr.bf16.mxu1 %v1464_v3  ;;  %v1554_v4 = vld [vmem:[%s1531_s30 + $0x24] ss:$16 sps:$4 sm:$0xff]   ;;  %v1559_v5 = vld [vmem:[%s1531_s30 + $0x20] ss:$16 sps:$4 sm:$0xff]   ;;  %v1566_v7 = vld [vmem:[%s1531_s30 + $0xc] ss:$16 sps:$4 sm:$0xff]  }
  0x1a   : > { %513 = vmatprep.subr.bf16.mxu0 %v1545_v1  ;;  %1310 = vset.pattern.permute.xlu0 %v1464_v3  ;;  %v1563_v6 = vld [vmem:[%s1531_s30 + $0x44] ss:$16 sps:$4 sm:$0xff]   ;;  %v1569_v8 = vld [vmem:[%s1531_s30 + $0x8] ss:$16 sps:$4 sm:$0xff]   ;;  %v1573_v9 = vld [vmem:[%s1531_s30 + $0x40] ss:$16 sps:$4 sm:$0xff]  }
  0x1b   : > { %514 = vmatpush1.bf16.msra.mxu0 %v1548_v2  ;;  %554 = vmatprep.subr.bf16.mxu1 %v1566_v7  ;;  %v1578_v10 = vld [vmem:[%s1531_s30 + $0x64] ss:$16 sps:$4 sm:$0xff]   ;;  %v1582_v11 = vld [vmem:[%s1531_s30 + $0x2c] ss:$16 sps:$4 sm:$0xff]   ;;  %v1585_v12 = vld [vmem:[%s1531_s30 + $0x28] ss:$16 sps:$4 sm:$0xff]  }
  0x1c   : > { %515 = vmatprep.subr.bf16.mxu0 %v1554_v4  ;;  %555 = vmatpush1.bf16.msra.mxu1 %v1569_v8  ;;  %v1590_v13 = vld [vmem:[%s1531_s30 + $0x60] ss:$16 sps:$4 sm:$0xff]   ;;  %v1593_v14 = vld [vmem:[%s1531_s30 + $0x84] ss:$16 sps:$4 sm:$0xff]   ;;  %v1596_v15 = vld [vmem:[%s1531_s30 + $0x4c] ss:$16 sps:$4 sm:$0xff]  }
  0x1d   : > { %556 = vmatprep.subr.bf16.mxu1 %v1582_v11  ;;  %v1601_v16 = vld [vmem:[%s1531_s30 + $0x48] ss:$16 sps:$4 sm:$0xff]   ;;  %v1605_v17 = vld [vmem:[%s1531_s30 + $0x6c] ss:$16 sps:$4 sm:$0xff]   ;;  %v1609_v18 = vld [vmem:[%s1531_s30 + $0x80] ss:$16 sps:$4 sm:$0xff]  }
  0x1e   : > { %v1613_v19 = vld [vmem:[%s1531_s30 + $0xa4] ss:$16 sps:$4 sm:$0xff]   ;;  %v1617_v20 = vld [vmem:[%s1531_s30 + $0x68] ss:$16 sps:$4 sm:$0xff]   ;;  %v1621_v21 = vld [vmem:[%s1531_s30 + $0x8c] ss:$16 sps:$4 sm:$0xff]  }
  0x1f   : > { %516 = vmatpush1.bf16.msra.mxu0 %v1559_v5  ;;  %v1624_v22 = vld [vmem:[%s1531_s30 + $0xa0] ss:$16 sps:$4 sm:$0xff]   ;;  %v1628_v23 = vld [vmem:[%s1531_s30 + $0xc4] ss:$16 sps:$4 sm:$0xff]   ;;  %v1633_v24 = vld [vmem:[%s1531_s30 + $0x88] ss:$16 sps:$4 sm:$0xff]  }
  0x20   : > { %517 = vmatprep.subr.bf16.mxu0 %v1563_v6  ;;  %557 = vmatpush1.bf16.msra.mxu1 %v1585_v12  ;;  %v1637_v25 = vld [vmem:[%s1531_s30 + $0xac] ss:$16 sps:$4 sm:$0xff]   ;;  %v332_v26 = vld [vmem:[%s1898_s2] sm:$0xff]  ;;  %v1652_v29 = vld [vmem:[%s1531_s30 + $0xa8] ss:$16 sps:$4 sm:$0xff]   ;;  %s635_s27 = sadd.s32 1, %s1719_s26 }
  0x21   : > { %558 = vmatprep.subr.bf16.mxu1 %v1596_v15  ;;  %334 = vperm.xlu0 %1310, %v332_v26   ;;  %v1644_v27 = vld [vmem:[%s1531_s30 + $0xc0] ss:$16 sps:$4 sm:$0xff]   ;;  %v1648_v28 = vld [vmem:[%s1531_s30 + $0xe4] ss:$16 sps:$4 sm:$0xff]   ;;  %v1656_v30 = vld [vmem:[%s1531_s30 + $0xcc] ss:$16 sps:$4 sm:$0xff]   ;;  %s636_s29 = smul.u32 %s635_s27, %s1520_s19 }
  0x22   : > { %v1660_v31 = vld [vmem:[%s1531_s30 + $0xe0] ss:$16 sps:$4 sm:$0xff]   ;;  %v1667_v33 = vld [vmem:[%s1531_s30 + $0xc8] ss:$16 sps:$4 sm:$0xff]   ;;  %v1671_v34 = vld [vmem:[%s1531_s30 + $0xec] ss:$16 sps:$4 sm:$0xff]  }
  0x23   : > { %518 = vmatpush1.bf16.msra.mxu0 %v1573_v9  ;;  %v1662_v32 = vld [vmem:[#allocation2] sm:$0xff]  ;;  %v1678_v36 = vld [vmem:[%s1531_s30 + $0xe8] ss:$16 sps:$4 sm:$0xff]   ;;  %s637_s28 = ssub.s32 6, %s1719_s26  ;;  %s772_s30 = sadd.s32 2, %s1719_s26 }
  0x24   : > { %519 = vmatprep.subr.bf16.mxu0 %v1578_v10  ;;  %559 = vmatpush1.bf16.msra.mxu1 %v1601_v16  ;;  %v352_v35 = vpack.c.bf16 %v1662_v32, %v1662_v32  ;;  %s638_s4 = smul.u32 %s1449_s13, %s637_s28  ;;  %s774_s6 = ssub.s32 5, %s1719_s26 }
  0x25   : > { %560 = vmatprep.subr.bf16.mxu1 %v1605_v17  ;;  %s773_s5 = smul.u32 %s772_s30, %s1520_s19  ;;  %s908_s8 = sadd.s32 3, %s1719_s26 }
  0x26   : > { %s775_s7 = smul.u32 %s1449_s13, %s774_s6  ;;  %s910_s9 = ssub.s32 4, %s1719_s26 }
  0x27   : > { %520 = vmatpush1.bf16.msra.mxu0 %v1590_v13  ;;  %s909_s12 = smul.u32 %s908_s8, %s1520_s19  ;;  %s639_s11 = sadd.s32 %s638_s4, %s636_s29 }
  0x28   : > { %521 = vmatprep.subr.bf16.mxu0 %v1593_v14  ;;  %561 = vmatpush1.bf16.msra.mxu1 %v1617_v20  ;;  %s911_s10 = smul.u32 %s1449_s13, %s910_s9  ;;  %s776_s21 = sadd.s32 %s775_s7, %s773_s5  ;;  %v1733_v37 = vstv %s639_s11 }
  0x29   : > { %562 = vmatprep.subr.bf16.mxu1 %v1621_v21  ;;  %v1735_v38 = vstv %s776_s21  ;;  %s1264_s23 = smul.u32 96, %s1449_s13  ;;  %s340_s27 = ssub.s32 7, %s1719_s26 }
  0x2a   : > { %s912_s22 = sadd.s32 %s911_s10, %s909_s12  ;;  %s339_s28 = smul.u32 %s1719_s26, %s1520_s19 }
  0x2b   : > { %522 = vmatpush1.bf16.msra.mxu0 %v1609_v18  ;;  %v1737_v39 = vstv %s912_s22  ;;  %s345_s25 = scalar_lea.vmem %s1541_s24, %s1264_s23  ;;  %s341_s29 = smul.u32 %s1449_s13, %s340_s27 }
  0x2c   : > { %523 = vmatprep.subr.bf16.mxu0 %v1613_v19  ;;  %563 = vmatpush1.bf16.msra.mxu1 %v1633_v24  ;;  %v346_v41 = vld [vmem:[%s345_s25] sm:$0xff]  ;;  %v347_v42 = vld [vmem:[%s345_s25 + $0x8] sm:$0xff]  ;;  %v349_v51 = vld [vmem:[%s345_s25 + $0x18] sm:$0xff]  ;;  %s1240_s26 = smul.u32 24, %s1449_s13  ;;  %s1241_s5 = sshll.u32 %s1449_s13, 1 }
  0x2d   : > { %564 = vmatprep.subr.bf16.mxu1 %v1637_v25  ;;  %v348_v57 = vld [vmem:[%s345_s25 + $0x10] sm:$0xff]  ;;  %s342_s30 = sadd.s32 %s341_s29, %s339_s28  ;;  %s1800_s6 = sadd.s32 %s1241_s5, %s1520_s19 }
  0x2e   : > { %s631_s4 = scalar_lea.vmem %s1536_s20, %s1240_s26  ;;  %s1265_s7 = sshll.u32 %s1800_s6, 5 }
  0x2f   : > { %524 = vmatpush1.bf16.msra.mxu0 %v1624_v22  ;;  %s642_s8 = scalar_lea.vmem %s1541_s24, %s1265_s7  ;;  %s1247_s9 = sshll.u32 %s1800_s6, 3 }
  0x30   : > { %525 = vmatprep.subr.bf16.mxu0 %v1628_v23  ;;  %565 = vmatpush1.bf16.msra.mxu1 %v1652_v29  ;;  %s768_s12 = scalar_lea.vmem %s1536_s20, %s1247_s9  ;;  %s1248_s10 = sshll.u32 %s1520_s19, 1 }
  0x31   : > { %566 = vmatprep.subr.bf16.mxu1 %v1656_v30  ;;  %s1856_s11 = sadd.s32 %s1449_s13, %s1248_s10  ;;  %s1267_s25 = smul.u32 96, %s1520_s19 }
  0x32   : > { %s1266_s21 = sshll.u32 %s1856_s11, 5  ;;  %s1254_s13 = sshll.u32 %s1856_s11, 3 }
  0x33   : > { %526 = vmatpush1.bf16.msra.mxu0 %v1644_v27  ;;  %s779_s22 = scalar_lea.vmem %s1541_s24, %s1266_s21  ;;  %s905_s23 = scalar_lea.vmem %s1536_s20, %s1254_s13 }
  0x34   : > { %527 = vmatprep.subr.bf16.mxu0 %v1648_v28  ;;  %567 = vmatpush1.bf16.msra.mxu1 %v1667_v33  ;;  %s915_s27 = scalar_lea.vmem %s1541_s24, %s1267_s25  ;;  %s1260_s24 = smul.u32 24, %s1520_s19 }
  0x35   : > { %568 = vmatprep.subr.bf16.mxu1 %v1671_v34 }
  0x36   : > { %s1041_s28 = scalar_lea.vmem %s1536_s20, %s1260_s24 }
  0x37   : > { %528 = vmatpush1.bf16.msra.mxu0 %v1660_v31 }
  0x38   : > { %650 = vmatprep.subr.bf16.mxu0 %v1545_v1  ;;  %569 = vmatpush1.bf16.msra.mxu1 %v1678_v36 }
  0x39   : > { %691 = vmatprep.subr.bf16.mxu1 %v1566_v7 }
  0x3a   : > { %546 = vmatmul.mubr.bf16.vlgmr.msra.gmra.mrb[0].mxu0 %v352_v35 }
  0x3b   : > { %651 = vmatpush1.bf16.msra.mxu0 %v1548_v2  ;;  %682 = vmatprep.mubr.bf16.mxu0 %v1464_v3 }
  0x3c   : > { %652 = vmatprep.subr.bf16.mxu0 %v1554_v4  ;;  %587 = vmatmul.mubr.bf16.vlgmr.msra.gmra.mrb[0].mxu1 %v352_v35  ;;  %v351_v35 = vld [vmem:[#allocation3] sm:$0xff] }
  0x3d   : > { %692 = vmatpush1.bf16.msra.mxu1 %v1569_v8  ;;  %723 = vmatprep.mubr.bf16.mxu1 %v1464_v3 }
  0x3e   : > { %693 = vmatprep.subr.bf16.mxu1 %v1582_v11 }
  0x3f   : > { %653 = vmatpush1.bf16.msra.mxu0 %v1559_v5 }
  0x40   : > { %654 = vmatprep.subr.bf16.mxu0 %v1563_v6 }
  0x41   : > { %694 = vmatpush1.bf16.msra.mxu1 %v1585_v12 }
  0x42   : > { %695 = vmatprep.subr.bf16.mxu1 %v1596_v15 }
  0x43   : > { %655 = vmatpush1.bf16.msra.mxu0 %v1573_v9 }
  0x44   : > { %656 = vmatprep.subr.bf16.mxu0 %v1578_v10 }
  0x45   : > { %696 = vmatpush1.bf16.msra.mxu1 %v1601_v16 }
  0x46   : > { %697 = vmatprep.subr.bf16.mxu1 %v1605_v17 }
  0x47   : > { %657 = vmatpush1.bf16.msra.mxu0 %v1590_v13 }
  0x48   : > { %658 = vmatprep.subr.bf16.mxu0 %v1593_v14 }
  0x49   : > { %698 = vmatpush1.bf16.msra.mxu1 %v1617_v20 }
  0x4a   : > { %699 = vmatprep.subr.bf16.mxu1 %v1621_v21 }
  0x4b   : > { %659 = vmatpush1.bf16.msra.mxu0 %v1609_v18 }
  0x4c   : > { %660 = vmatprep.subr.bf16.mxu0 %v1613_v19 }
  0x4d   : > { %700 = vmatpush1.bf16.msra.mxu1 %v1633_v24 }
  0x4e   : > { %701 = vmatprep.subr.bf16.mxu1 %v1637_v25 }
  0x4f   : > { %661 = vmatpush1.bf16.msra.mxu0 %v1624_v22 }
  0x50   : > { %662 = vmatprep.subr.bf16.mxu0 %v1628_v23 }
  0x51   : > { %702 = vmatpush1.bf16.msra.mxu1 %v1652_v29 }
  0x52   : > { %703 = vmatprep.subr.bf16.mxu1 %v1656_v30 }
  0x53   : > { %663 = vmatpush1.bf16.msra.mxu0 %v1644_v27 }
  0x54   : > { %664 = vmatprep.subr.bf16.mxu0 %v1648_v28 }
  0x55   : > { %704 = vmatpush1.bf16.msra.mxu1 %v1667_v33 }
  0x56   : > { %705 = vmatprep.subr.bf16.mxu1 %v1671_v34 }
  0x57   : > { %665 = vmatpush1.bf16.msra.mxu0 %v1660_v31 }
  0x58   : > { %787 = vmatprep.subr.bf16.mxu0 %v1545_v1 }
  0x59   : > { %706 = vmatpush1.bf16.msra.mxu1 %v1678_v36 }
  0x5a   : > { %828 = vmatprep.subr.bf16.mxu1 %v1566_v7 }
  0xa0   : > { %v1739_v40 = vpop.permute.xlu0 %334 }
  0xa1   : > { %vm761_vm0 = vcmp.lt.s32.totalorder %v1733_v37, %v1739_v40  ;;  %vm898_vm1 = vcmp.lt.s32.totalorder %v1735_v38, %v1739_v40  ;;  %vm1034_vm2 = vcmp.lt.s32.totalorder %v1737_v39, %v1739_v40 }
 0x10d   : > { %v547_v43 = vpop.f32.mrb[0].mxu0 }
 0x10e   : > { %v595_v44 = vadd.f32 %v547_v43, %v346_v41  ;;  %v549_v45 = vpop.f32.mrb[1].mxu0  ;;  %v623_v43 = vstv %s342_s30 }
 0x10f   : > { %v596_v46 = vadd.f32 %v549_v45, %v347_v42  ;;  %v551_v47 = vpop.f32.mrb[2].mxu0  ;;  %v588_v52 = vpop.f32.mrb[0].mxu1  ;;  %vm624_vm3 = vcmp.lt.s32.totalorder %v623_v43, %v1739_v40 }
 0x110   : > { %v1237_v48 = vmul.f32 -1.442695, %v595_v44  ;;  %v552_v49 = vpop.f32.mrb[3].mxu0  ;;  %v590_v53 = vpop.f32.mrb[1].mxu1  ;;  %v597_v59 = vadd.f32 %v588_v52, %v348_v57 }
 0x111   : > { %v1238_v50 = vmul.f32 -1.442695, %v596_v46  ;;  %v598_v54 = vadd.f32 %v590_v53, %v349_v51  ;;  %v592_v55 = vpop.f32.mrb[2].mxu1 }
 0x112   : > { %1359 = vpow2.f32 %v1237_v48  ;;  %v593_v56 = vpop.f32.mrb[3].mxu1 }
 0x113   : > { %1361 = vpow2.f32 %v1238_v50  ;;  %v1239_v58 = vmul.f32 -1.442695, %v598_v54  ;;  %v644_v54 = vld [vmem:[%s642_s8 + $0x8] sm:$0xff] }
 0x115   : > { %1363 = vpow2.f32 %v1239_v58 }
 0x116   : > { %1365 = vtanh.f32 %v597_v59 }
 0x11c   : > { %v1360_v60 = vpop.eup %1359 }
 0x11d   : > { %v1362_v61 = vpop.eup %1361  ;;  %v602_v62 = vadd.f32 1.0, %v1360_v60 }
 0x11e   : > { %v608_v63 = vadd.f32 1.0, %v1362_v61 }
 0x11f   : > { %1367 = vrcp.f32 %v602_v62  ;;  %v1364_v0 = vpop.eup %1363 }
 0x120   : > { %1369 = vrcp.f32 %v608_v63  ;;  %v1366_v26 = vpop.eup %1365  ;;  %v615_v42 = vadd.f32 1.0, %v1364_v0 }
 0x122   : > { %1371 = vrcp.f32 %v615_v42 }
 0x129   : > { %v1368_v41 = vpop.eup %1367 }
 0x12a   : > { %v1370_v44 = vpop.eup %1369  ;;  %v619_v45 = vmul.f32 %v1368_v41, %v1366_v26  ;;  %v646_v26 = vld [vmem:[%s642_s8 + $0x18] sm:$0xff]  ;;  %v645_v41 = vld [vmem:[%s642_s8 + $0x10] sm:$0xff] }
 0x12b   : > { %v618_v46 = vmul.f32 %v1370_v44, %v351_v35 }
 0x12c   : > { %v1372_v49 = vpop.eup %1371 }
 0x12d   : > { %v620_v47 = vadd.f32 %v619_v45, %v618_v46 }
 0x12f   : > { %1373 = vtanh.f32 %v620_v47  ;;  %v1754_v48 = vsel %vm624_vm3, %v620_v47, %v351_v35 }
 0x139   : > { %v1374_v50 = vpop.eup %1373 }
 0x13a   : > { %v622_v51 = vmul.f32 %v1374_v50, %v1372_v49 }
 0x13c   : > { %v1759_v52 = vsel %vm624_vm3, %v622_v51, %v1662_v32  ;;  %v643_v32 = vld [vmem:[%s642_s8] sm:$0xff] }
 0x13d   : > { %v649_v53 = vpack.c.bf16 %v1759_v52, %v1759_v52  ;;  %632 = vst [vmem:[%s631_s4] sm:$0xff] %v1759_v52 }
 0x13f   : > { %683 = vmatmul.mubr.bf16.vlgmr.msra.gmra.mrb[4].mxu0 %v649_v53  ;;  %724 = vmatmul.mubr.bf16.vlgmr.msra.gmra.mrb[4].mxu1 %v649_v53 }
 0x140   : > { %788 = vmatpush1.bf16.msra.mxu0 %v1548_v2  ;;  %829 = vmatpush1.bf16.msra.mxu1 %v1569_v8 }
 0x141   : > { %789 = vmatprep.subr.bf16.mxu0 %v1554_v4  ;;  %830 = vmatprep.subr.bf16.mxu1 %v1582_v11 }
 0x142   : > { %819 = vmatprep.mubr.bf16.mxu0 %v1464_v3  ;;  %860 = vmatprep.mubr.bf16.mxu1 %v1464_v3 }
 0x144   : > { %790 = vmatpush1.bf16.msra.mxu0 %v1559_v5  ;;  %831 = vmatpush1.bf16.msra.mxu1 %v1585_v12 }
 0x145   : > { %791 = vmatprep.subr.bf16.mxu0 %v1563_v6  ;;  %832 = vmatprep.subr.bf16.mxu1 %v1596_v15 }
 0x148   : > { %792 = vmatpush1.bf16.msra.mxu0 %v1573_v9  ;;  %833 = vmatpush1.bf16.msra.mxu1 %v1601_v16 }
 0x149   : > { %793 = vmatprep.subr.bf16.mxu0 %v1578_v10  ;;  %834 = vmatprep.subr.bf16.mxu1 %v1605_v17 }
 0x14c   : > { %794 = vmatpush1.bf16.msra.mxu0 %v1590_v13  ;;  %835 = vmatpush1.bf16.msra.mxu1 %v1617_v20 }
 0x14d   : > { %795 = vmatprep.subr.bf16.mxu0 %v1593_v14  ;;  %836 = vmatprep.subr.bf16.mxu1 %v1621_v21 }
 0x150   : > { %796 = vmatpush1.bf16.msra.mxu0 %v1609_v18  ;;  %837 = vmatpush1.bf16.msra.mxu1 %v1633_v24 }
 0x151   : > { %797 = vmatprep.subr.bf16.mxu0 %v1613_v19  ;;  %838 = vmatprep.subr.bf16.mxu1 %v1637_v25 }
 0x154   : > { %798 = vmatpush1.bf16.msra.mxu0 %v1624_v22  ;;  %839 = vmatpush1.bf16.msra.mxu1 %v1652_v29 }
 0x155   : > { %799 = vmatprep.subr.bf16.mxu0 %v1628_v23  ;;  %840 = vmatprep.subr.bf16.mxu1 %v1656_v30 }
 0x158   : > { %800 = vmatpush1.bf16.msra.mxu0 %v1644_v27  ;;  %841 = vmatpush1.bf16.msra.mxu1 %v1667_v33 }
 0x159   : > { %801 = vmatprep.subr.bf16.mxu0 %v1648_v28  ;;  %842 = vmatprep.subr.bf16.mxu1 %v1671_v34 }
 0x15c   : > { %802 = vmatpush1.bf16.msra.mxu0 %v1660_v31  ;;  %843 = vmatpush1.bf16.msra.mxu1 %v1678_v36 }
 0x15d   : > { %923 = vmatprep.subr.bf16.mxu0 %v1545_v1  ;;  %964 = vmatprep.subr.bf16.mxu1 %v1566_v7 }
 0x212   : > { %v684_v55 = vpop.f32.mrb[4].mxu0  ;;  %v725_v56 = vpop.f32.mrb[4].mxu1 }
 0x213   : > { %v732_v57 = vadd.f32 %v684_v55, %v643_v32  ;;  %v686_v58 = vpop.f32.mrb[5].mxu0  ;;  %v727_v59 = vpop.f32.mrb[5].mxu1  ;;  %v734_v43 = vadd.f32 %v725_v56, %v645_v41 }
 0x214   : > { %v733_v60 = vadd.f32 %v686_v58, %v644_v54  ;;  %v688_v61 = vpop.f32.mrb[6].mxu0  ;;  %v729_v62 = vpop.f32.mrb[6].mxu1  ;;  %v735_v35 = vadd.f32 %v727_v59, %v646_v26  ;;  %v917_v26 = vld [vmem:[%s915_s27 + $0x8] sm:$0xff] }
 0x215   : > { %v1244_v63 = vmul.f32 -1.442695, %v732_v57  ;;  %v689_v1 = vpop.f32.mrb[7].mxu0  ;;  %v730_v0 = vpop.f32.mrb[7].mxu1 }
 0x216   : > { %v1245_v7 = vmul.f32 -1.442695, %v733_v60  ;;  %v1246_v42 = vmul.f32 -1.442695, %v735_v35 }
 0x217   : > { %1375 = vpow2.f32 %v1244_v63 }
 0x218   : > { %1377 = vpow2.f32 %v1245_v7  ;;  %v916_v7 = vld [vmem:[%s915_s27] sm:$0xff] }
 0x219   : > { %1379 = vpow2.f32 %v1246_v42 }
 0x21a   : > { %1381 = vtanh.f32 %v734_v43 }
 0x221   : > { %v1376_v44 = vpop.eup %1375 }
 0x222   : > { %v1378_v45 = vpop.eup %1377  ;;  %v739_v46 = vadd.f32 1.0, %v1376_v44 }
 0x223   : > { %v745_v47 = vadd.f32 1.0, %v1378_v45  ;;  %v1380_v49 = vpop.eup %1379 }
 0x224   : > { %1383 = vrcp.f32 %v739_v46  ;;  %v1382_v50 = vpop.eup %1381  ;;  %v752_v54 = vadd.f32 1.0, %v1380_v49 }
 0x225   : > { %1385 = vrcp.f32 %v745_v47 }
 0x226   : > { %1387 = vrcp.f32 %v752_v54  ;;  %v918_v54 = vld [vmem:[%s915_s27 + $0x10] sm:$0xff] }
 0x22e   : > { %v1384_v51 = vpop.eup %1383 }
 0x22f   : > { %v1386_v53 = vpop.eup %1385  ;;  %v756_v32 = vmul.f32 %v1384_v51, %v1382_v50 }
 0x230   : > { %v755_v55 = vmul.f32 %v1386_v53, %v1754_v48  ;;  %v1388_v58 = vpop.eup %1387  ;;  %v919_v53 = vld [vmem:[%s915_s27 + $0x18] sm:$0xff] }
 0x232   : > { %v757_v57 = vadd.f32 %v756_v32, %v755_v55 }
 0x234   : > { %1389 = vtanh.f32 %v757_v57  ;;  %v1809_v56 = vsel %vm761_vm0, %v757_v57, %v1754_v48 }
 0x23e   : > { %v1390_v59 = vpop.eup %1389 }
 0x23f   : > { %v759_v60 = vmul.f32 %v1390_v59, %v1388_v58 }
 0x241   : > { %v1817_v61 = vsel %vm761_vm0, %v759_v60, %v1759_v52 }
 0x242   : > { %v786_v62 = vpack.c.bf16 %v1817_v61, %v1817_v61  ;;  %769 = vst [vmem:[%s768_s12] sm:$0xff] %v1817_v61 }
 0x244   : > { %820 = vmatmul.mubr.bf16.vlgmr.msra.gmra.mrb[8].mxu0 %v786_v62  ;;  %861 = vmatmul.mubr.bf16.vlgmr.msra.gmra.mrb[8].mxu1 %v786_v62 }
 0x245   : > { %924 = vmatpush1.bf16.msra.mxu0 %v1548_v2  ;;  %965 = vmatpush1.bf16.msra.mxu1 %v1569_v8  ;;  %v780_v2 = vld [vmem:[%s779_s22] sm:$0xff] }
 0x246   : > { %925 = vmatprep.subr.bf16.mxu0 %v1554_v4  ;;  %966 = vmatprep.subr.bf16.mxu1 %v1582_v11 }
 0x247   : > { %955 = vmatprep.mubr.bf16.mxu0 %v1464_v3  ;;  %996 = vmatprep.mubr.bf16.mxu1 %v1464_v3  ;;  %v781_v3 = vld [vmem:[%s779_s22 + $0x8] sm:$0xff] }
 0x249   : > { %926 = vmatpush1.bf16.msra.mxu0 %v1559_v5  ;;  %967 = vmatpush1.bf16.msra.mxu1 %v1585_v12 }
 0x24a   : > { %927 = vmatprep.subr.bf16.mxu0 %v1563_v6  ;;  %968 = vmatprep.subr.bf16.mxu1 %v1596_v15 }
 0x24d   : > { %928 = vmatpush1.bf16.msra.mxu0 %v1573_v9  ;;  %969 = vmatpush1.bf16.msra.mxu1 %v1601_v16 }
 0x24e   : > { %929 = vmatprep.subr.bf16.mxu0 %v1578_v10  ;;  %970 = vmatprep.subr.bf16.mxu1 %v1605_v17  ;;  %v783_v17 = vld [vmem:[%s779_s22 + $0x18] sm:$0xff] }
 0x251   : > { %930 = vmatpush1.bf16.msra.mxu0 %v1590_v13  ;;  %971 = vmatpush1.bf16.msra.mxu1 %v1617_v20 }
 0x252   : > { %931 = vmatprep.subr.bf16.mxu0 %v1593_v14  ;;  %972 = vmatprep.subr.bf16.mxu1 %v1621_v21 }
 0x255   : > { %932 = vmatpush1.bf16.msra.mxu0 %v1609_v18  ;;  %973 = vmatpush1.bf16.msra.mxu1 %v1633_v24 }
 0x256   : > { %933 = vmatprep.subr.bf16.mxu0 %v1613_v19  ;;  %974 = vmatprep.subr.bf16.mxu1 %v1637_v25  ;;  %v782_v19 = vld [vmem:[%s779_s22 + $0x10] sm:$0xff] }
 0x259   : > { %934 = vmatpush1.bf16.msra.mxu0 %v1624_v22  ;;  %975 = vmatpush1.bf16.msra.mxu1 %v1652_v29 }
 0x25a   : > { %935 = vmatprep.subr.bf16.mxu0 %v1628_v23  ;;  %976 = vmatprep.subr.bf16.mxu1 %v1656_v30 }
 0x25d   : > { %936 = vmatpush1.bf16.msra.mxu0 %v1644_v27  ;;  %977 = vmatpush1.bf16.msra.mxu1 %v1667_v33 }
 0x25e   : > { %937 = vmatprep.subr.bf16.mxu0 %v1648_v28  ;;  %978 = vmatprep.subr.bf16.mxu1 %v1671_v34 }
 0x261   : > { %938 = vmatpush1.bf16.msra.mxu0 %v1660_v31  ;;  %979 = vmatpush1.bf16.msra.mxu1 %v1678_v36 }
 0x317   : > { %v821_v4 = vpop.f32.mrb[8].mxu0  ;;  %v862_v5 = vpop.f32.mrb[8].mxu1 }
 0x318   : > { %v869_v6 = vadd.f32 %v821_v4, %v780_v2  ;;  %v823_v8 = vpop.f32.mrb[9].mxu0  ;;  %v864_v9 = vpop.f32.mrb[9].mxu1  ;;  %v871_v21 = vadd.f32 %v862_v5, %v782_v19 }
 0x319   : > { %v870_v10 = vadd.f32 %v823_v8, %v781_v3  ;;  %v825_v11 = vpop.f32.mrb[10].mxu0  ;;  %v866_v12 = vpop.f32.mrb[10].mxu1  ;;  %v872_v18 = vadd.f32 %v864_v9, %v783_v17 }
 0x31a   : > { %v1251_v13 = vmul.f32 -1.442695, %v869_v6  ;;  %v826_v14 = vpop.f32.mrb[11].mxu0  ;;  %v867_v15 = vpop.f32.mrb[11].mxu1 }
 0x31b   : > { %v1252_v16 = vmul.f32 -1.442695, %v870_v10  ;;  %v1253_v20 = vmul.f32 -1.442695, %v872_v18 }
 0x31c   : > { %1391 = vpow2.f32 %v1251_v13 }
 0x31d   : > { %1393 = vpow2.f32 %v1252_v16 }
 0x31e   : > { %1395 = vpow2.f32 %v1253_v20 }
 0x31f   : > { %1397 = vtanh.f32 %v871_v21 }
 0x326   : > { %v1392_v22 = vpop.eup %1391 }
 0x327   : > { %v1394_v23 = vpop.eup %1393  ;;  %v876_v24 = vadd.f32 1.0, %v1392_v22 }
 0x328   : > { %v882_v25 = vadd.f32 1.0, %v1394_v23  ;;  %v1396_v27 = vpop.eup %1395 }
 0x329   : > { %1399 = vrcp.f32 %v876_v24  ;;  %v1398_v28 = vpop.eup %1397  ;;  %v889_v33 = vadd.f32 1.0, %v1396_v27 }
 0x32a   : > { %1401 = vrcp.f32 %v882_v25 }
 0x32b   : > { %1403 = vrcp.f32 %v889_v33 }
 0x333   : > { %v1400_v29 = vpop.eup %1399 }
 0x334   : > { %v1402_v30 = vpop.eup %1401  ;;  %v893_v31 = vmul.f32 %v1400_v29, %v1398_v28 }
 0x335   : > { %v892_v34 = vmul.f32 %v1402_v30, %v1809_v56  ;;  %v1404_v48 = vpop.eup %1403 }
 0x337   : > { %v894_v36 = vadd.f32 %v893_v31, %v892_v34 }
 0x339   : > { %1405 = vtanh.f32 %v894_v36  ;;  %v899_v37 = vsel %vm898_vm1, %v894_v36, %v1809_v56 }
 0x343   : > { %v1406_v52 = vpop.eup %1405 }
 0x344   : > { %v896_v63 = vmul.f32 %v1406_v52, %v1404_v48 }
 0x346   : > { %v901_v1 = vsel %vm898_vm1, %v896_v63, %v1817_v61 }
 0x347   : > { %v922_v0 = vpack.c.bf16 %v901_v1, %v901_v1  ;;  %906 = vst [vmem:[%s905_s23] sm:$0xff] %v901_v1 }
 0x349   : > { %956 = vmatmul.mubr.bf16.vlgmr.msra.gmra.mrb[12].mxu0 %v922_v0  ;;  %997 = vmatmul.mubr.bf16.vlgmr.msra.gmra.mrb[12].mxu1 %v922_v0 }
 0x41c   : > { %v957_v35 = vpop.f32.mrb[12].mxu0  ;;  %v998_v41 = vpop.f32.mrb[12].mxu1 }
 0x41d   : > { %v1005_v42 = vadd.f32 %v957_v35, %v916_v7  ;;  %v959_v43 = vpop.f32.mrb[13].mxu0  ;;  %v1000_v44 = vpop.f32.mrb[13].mxu1  ;;  %v1007_v57 = vadd.f32 %v998_v41, %v918_v54 }
 0x41e   : > { %v1006_v45 = vadd.f32 %v959_v43, %v917_v26  ;;  %v961_v46 = vpop.f32.mrb[14].mxu0  ;;  %v1002_v47 = vpop.f32.mrb[14].mxu1  ;;  %v1008_v32 = vadd.f32 %v1000_v44, %v919_v53 }
 0x41f   : > { %v1257_v49 = vmul.f32 -1.442695, %v1005_v42  ;;  %v962_v50 = vpop.f32.mrb[15].mxu0  ;;  %v1003_v38 = vpop.f32.mrb[15].mxu1 }
 0x420   : > { %v1258_v51 = vmul.f32 -1.442695, %v1006_v45  ;;  %v1259_v55 = vmul.f32 -1.442695, %v1008_v32 }
 0x421   : > { %1407 = vpow2.f32 %v1257_v49 }
 0x422   : > { %1409 = vpow2.f32 %v1258_v51 }
 0x423   : > { %1411 = vpow2.f32 %v1259_v55 }
 0x424   : > { %1413 = vtanh.f32 %v1007_v57 }
 0x42b   : > { %v1408_v56 = vpop.eup %1407 }
 0x42c   : > { %v1410_v58 = vpop.eup %1409  ;;  %v1012_v59 = vadd.f32 1.0, %v1408_v56 }
 0x42d   : > { %v1018_v60 = vadd.f32 1.0, %v1410_v58  ;;  %v1412_v61 = vpop.eup %1411 }
 0x42e   : > { %1415 = vrcp.f32 %v1012_v59  ;;  %v1414_v62 = vpop.eup %1413  ;;  %v1025_v5 = vadd.f32 1.0, %v1412_v61 }
 0x42f   : > { %1417 = vrcp.f32 %v1018_v60 }
 0x430   : > { %1419 = vrcp.f32 %v1025_v5 }
 0x438   : > { %v1416_v2 = vpop.eup %1415 }
 0x439   : > { %v1418_v3 = vpop.eup %1417  ;;  %v1029_v4 = vmul.f32 %v1416_v2, %v1414_v62 }
 0x43a   : > { %v1028_v6 = vmul.f32 %v1418_v3, %v899_v37  ;;  %v1420_v10 = vpop.eup %1419 }
 0x43c   : > { %v1030_v8 = vadd.f32 %v1029_v4, %v1028_v6 }
 0x43e   : > { %1421 = vtanh.f32 %v1030_v8  ;;  %v1035_v9 = vsel %vm1034_vm2, %v1030_v8, %v899_v37 }
 0x43f   : > { %1036 = vst [vmem:[#allocation3] sm:$0xff] %v1035_v9 }
 0x448   : > { %v1422_v11 = vpop.eup %1421 }
 0x449   : > { %v1032_v12 = vmul.f32 %v1422_v11, %v1420_v10 }
 0x44b   : > { %v1037_v13 = vsel %vm1034_vm2, %v1032_v12, %v901_v1 }
 0x44c   : > { %1038 = vst [vmem:[#allocation2] sm:$0xff] %v1037_v13  ;;  %1042 = vst [vmem:[%s1041_s28] sm:$0xff] %v1037_v13 }
 0x44d PF: > { %s13_s16 = sadd.s32 1, %s1461_s16   ;;  %s1900_s12 = smov %s1453_s14 }
 0x44e   : > { %p10_p8 = scmp.ge.s32.totalorder %s13_s16, 6   ;;  %s1901_s13 = smov %s1457_s15 }
 0x44f   : > { %s1902_s14 = smov %s1905_s17  ;;  %s1903_s15 = smov %s1909_s18 }
 0x450   :  { %12 = sbr.rel (!%p10_p8) target bundleno = 3 (0x3), region = 77 }

// kernel: forward.5
= control target key start
LH: loop header
LB: loop body
LE: loop exit
PB: predicated region body
PF: predicated region fallthrough
CT: control target
= control target key end

     0   :  { %v845_v1 = vmov 0   ;;  %s1118_s1 = inlined_call_operand.vmem [shape: bf16[384,256], index: 1, kind: input, shape index: {}]   ;;  %s1119_s0 = inlined_call_operand.vmem [shape: f32[8,384], index: 0, kind: input, shape index: {}]   ;;  %s1120_s7 = inlined_call_operand.vmem [shape: bf16[256,128], index: 7, kind: input, shape index: {}]   ;;  %s1121_s6 = inlined_call_operand.vmem [shape: f32[1,256], index: 6, kind: input, shape index: {}]   ;;  %s1122_s2 = inlined_call_operand.vmem [shape: f32[1,256], index: 2, kind: input, shape index: {}]   ;;  %s1123_s5 = inlined_call_operand.vmem [shape: f32[1,256], index: 5, kind: input, shape index: {}]   ;;  %s1124_s3 = inlined_call_operand.vmem [shape: f32[1,256], index: 3, kind: input, shape index: {}]   ;;  %s1125_s4 = inlined_call_operand.vmem [shape: f32[1,256], index: 4, kind: input, shape index: {}]   ;;  %s1126_s8 = inlined_call_operand.vmem [shape: f32[1,128], index: 8, kind: input, shape index: {}]   ;;  %s1127_s9 = inlined_call_operand.vmem [shape: f32[8,128], index: 9, kind: output, shape index: {}]  }
   0x1   :  { %v755_v0 = vld [vmem:[%s1118_s1 + $0x4] ss:$8 sps:$4 sm:$0xff]   ;;  %412 = vmatprep.mubr.bf16.mxu1 %v845_v1  ;;  %v757_v2 = vld [vmem:[%s1118_s1] ss:$8 sps:$4 sm:$0xff]   ;;  %v758_v3 = vld [vmem:[%s1118_s1 + $0x14] ss:$8 sps:$4 sm:$0xff]  }
   0x2   :  { %339 = vmatprep.subr.bf16.mxu0 %v755_v0  ;;  %v760_v4 = vld [vmem:[%s1118_s1 + $0x10] ss:$8 sps:$4 sm:$0xff]   ;;  %v761_v5 = vld [vmem:[%s1118_s1 + $0x24] ss:$8 sps:$4 sm:$0xff]   ;;  %v763_v6 = vld [vmem:[%s1118_s1 + $0x20] ss:$8 sps:$4 sm:$0xff]  }
   0x3   :  { %340 = vmatpush1.bf16.msra.mxu0 %v757_v2  ;;  %v764_v7 = vld [vmem:[%s1118_s1 + $0x34] ss:$8 sps:$4 sm:$0xff]   ;;  %v766_v8 = vld [vmem:[%s1118_s1 + $0x30] ss:$8 sps:$4 sm:$0xff]   ;;  %v779_v9 = vld [vmem:[%s1118_s1 + $0x104] ss:$8 sps:$4 sm:$0xff]  }
   0x4   :  { %341 = vmatprep.subr.bf16.mxu0 %v758_v3  ;;  %v767_v10 = vld [vmem:[%s1118_s1 + $0x44] ss:$8 sps:$4 sm:$0xff]   ;;  %v783_v11 = vld [vmem:[%s1118_s1 + $0x100] ss:$8 sps:$4 sm:$0xff]   ;;  %380 = vmatprep.subr.bf16.mxu1 %v779_v9  ;;  %v785_v12 = vld [vmem:[%s1118_s1 + $0x114] ss:$8 sps:$4 sm:$0xff]  }
   0x5   :  { %381 = vmatpush1.bf16.msra.mxu1 %v783_v11  ;;  %v769_v13 = vld [vmem:[%s1118_s1 + $0x40] ss:$8 sps:$4 sm:$0xff]   ;;  %v770_v14 = vld [vmem:[%s1118_s1 + $0x54] ss:$8 sps:$4 sm:$0xff]   ;;  %v789_v15 = vld [vmem:[%s1118_s1 + $0x110] ss:$8 sps:$4 sm:$0xff]  }
   0x6   :  { %382 = vmatprep.subr.bf16.mxu1 %v785_v12  ;;  %v791_v16 = vld [vmem:[%s1118_s1 + $0x124] ss:$8 sps:$4 sm:$0xff]   ;;  %v772_v17 = vld [vmem:[%s1118_s1 + $0x50] ss:$8 sps:$4 sm:$0xff]   ;;  %v795_v18 = vld [vmem:[%s1118_s1 + $0x120] ss:$8 sps:$4 sm:$0xff]   ;;  %v89_v12 = vlaneseq }
   0x7   :  { %342 = vmatpush1.bf16.msra.mxu0 %v760_v4  ;;  %v797_v19 = vld [vmem:[%s1118_s1 + $0x134] ss:$8 sps:$4 sm:$0xff]   ;;  %v773_v20 = vld [vmem:[%s1118_s1 + $0x64] ss:$8 sps:$4 sm:$0xff]   ;;  %v801_v21 = vld [vmem:[%s1118_s1 + $0x130] ss:$8 sps:$4 sm:$0xff]  }
   0x8   :  { %343 = vmatprep.subr.bf16.mxu0 %v761_v5  ;;  %v775_v22 = vld [vmem:[%s1118_s1 + $0x60] ss:$8 sps:$4 sm:$0xff]   ;;  %v803_v23 = vld [vmem:[%s1118_s1 + $0x144] ss:$8 sps:$4 sm:$0xff]   ;;  %v776_v24 = vld [vmem:[%s1118_s1 + $0x74] ss:$8 sps:$4 sm:$0xff]  }
   0x9   :  { %383 = vmatpush1.bf16.msra.mxu1 %v789_v15  ;;  %v778_v25 = vld [vmem:[%s1118_s1 + $0x70] ss:$8 sps:$4 sm:$0xff]   ;;  %v807_v26 = vld [vmem:[%s1118_s1 + $0x140] ss:$8 sps:$4 sm:$0xff]   ;;  %v809_v27 = vld [vmem:[%s1118_s1 + $0x154] ss:$8 sps:$4 sm:$0xff]  }
   0xa   :  { %384 = vmatprep.subr.bf16.mxu1 %v791_v16  ;;  %v781_v28 = vld [vmem:[%s1118_s1 + $0x84] ss:$8 sps:$4 sm:$0xff]   ;;  %v813_v29 = vld [vmem:[%s1118_s1 + $0x150] ss:$8 sps:$4 sm:$0xff]   ;;  %v784_v30 = vld [vmem:[%s1118_s1 + $0x80] ss:$8 sps:$4 sm:$0xff]  }
   0xb   :  { %344 = vmatpush1.bf16.msra.mxu0 %v763_v6  ;;  %v815_v31 = vld [vmem:[%s1118_s1 + $0x164] ss:$8 sps:$4 sm:$0xff]   ;;  %v787_v32 = vld [vmem:[%s1118_s1 + $0x94] ss:$8 sps:$4 sm:$0xff]   ;;  %v790_v34 = vld [vmem:[%s1118_s1 + $0x90] ss:$8 sps:$4 sm:$0xff]  }
   0xc   :  { %345 = vmatprep.subr.bf16.mxu0 %v764_v7  ;;  %v34_v33 = vld [vmem:[%s1119_s0 + $0x8] sm:$0xff]  ;;  %v821_v38 = vld [vmem:[%s1118_s1 + $0x174] ss:$8 sps:$4 sm:$0xff]   ;;  %v825_v39 = vld [vmem:[%s1118_s1 + $0x170] ss:$8 sps:$4 sm:$0xff]  }
   0xd   :  { %385 = vmatpush1.bf16.msra.mxu1 %v795_v18  ;;  %v37_v35 = vpack.c.bf16 %v34_v33, %v34_v33  ;;  %v793_v36 = vld [vmem:[%s1118_s1 + $0xa4] ss:$8 sps:$4 sm:$0xff]   ;;  %v819_v37 = vld [vmem:[%s1118_s1 + $0x160] ss:$8 sps:$4 sm:$0xff]   ;;  %v35_v41 = vld [vmem:[%s1119_s0 + $0x10] sm:$0xff] }
   0xe   :  { %386 = vmatprep.subr.bf16.mxu1 %v797_v19  ;;  %v796_v40 = vld [vmem:[%s1118_s1 + $0xa0] ss:$8 sps:$4 sm:$0xff]   ;;  %v799_v42 = vld [vmem:[%s1118_s1 + $0xb4] ss:$8 sps:$4 sm:$0xff]   ;;  %v802_v45 = vld [vmem:[%s1118_s1 + $0xb0] ss:$8 sps:$4 sm:$0xff]   ;;  %v38_v46 = vpack.c.bf16 %v35_v41, %v35_v41 }
   0xf   :  { %346 = vmatpush1.bf16.msra.mxu0 %v766_v8  ;;  %371 = vmatprep.mubr.bf16.mxu0 %v37_v35  ;;  %v827_v43 = vld [vmem:[%s1120_s7 + $0x40] sm:$0xff]   ;;  %v829_v47 = vld [vmem:[%s1120_s7 + $0x48] sm:$0xff]   ;;  %v831_v51 = vld [vmem:[%s1120_s7 + $0x50] sm:$0xff]  }
  0x10   :  { %347 = vmatprep.subr.bf16.mxu0 %v767_v10  ;;  %v828_v44 = vld [vmem:[%s1120_s7] sm:$0xff]   ;;  %v830_v49 = vld [vmem:[%s1120_s7 + $0x8] sm:$0xff]   ;;  %v811_v52 = vld [vmem:[%s1118_s1 + $0xd4] ss:$8 sps:$4 sm:$0xff]  }
  0x11   :  { %387 = vmatpush1.bf16.msra.mxu1 %v801_v21  ;;  %v805_v48 = vld [vmem:[%s1118_s1 + $0xc4] ss:$8 sps:$4 sm:$0xff]   ;;  %v808_v50 = vld [vmem:[%s1118_s1 + $0xc0] ss:$8 sps:$4 sm:$0xff]   ;;  %v832_v53 = vld [vmem:[%s1120_s7 + $0x10] sm:$0xff]  }
  0x12   :  { %388 = vmatprep.subr.bf16.mxu1 %v803_v23  ;;  %v814_v54 = vld [vmem:[%s1118_s1 + $0xd0] ss:$8 sps:$4 sm:$0xff]   ;;  %v817_v55 = vld [vmem:[%s1118_s1 + $0xe4] ss:$8 sps:$4 sm:$0xff]   ;;  %v820_v56 = vld [vmem:[%s1118_s1 + $0xe0] ss:$8 sps:$4 sm:$0xff]  }
  0x13   :  { %348 = vmatpush1.bf16.msra.mxu0 %v769_v13  ;;  %v823_v57 = vld [vmem:[%s1118_s1 + $0xf4] ss:$8 sps:$4 sm:$0xff]   ;;  %v826_v58 = vld [vmem:[%s1118_s1 + $0xf0] ss:$8 sps:$4 sm:$0xff]   ;;  %v33_v59 = vld [vmem:[%s1119_s0] sm:$0xff] }
  0x14   :  { %349 = vmatprep.subr.bf16.mxu0 %v770_v14  ;;  %v36_v60 = vpack.c.bf16 %v33_v59, %v33_v59  ;;  %v833_v61 = vld [vmem:[%s1120_s7 + $0x58] sm:$0xff]   ;;  %v835_v63 = vld [vmem:[%s1120_s7 + $0x60] sm:$0xff]   ;;  %v837_v1 = vld [vmem:[%s1120_s7 + $0x68] sm:$0xff]   ;;  %v90_v14 = vshrl.u32 %v89_v12, 7 }
  0x15   :  { %389 = vmatpush1.bf16.msra.mxu1 %v807_v26  ;;  %v834_v62 = vld [vmem:[%s1120_s7 + $0x18] sm:$0xff]   ;;  %v836_v0 = vld [vmem:[%s1120_s7 + $0x20] sm:$0xff]   ;;  %v838_v2 = vld [vmem:[%s1120_s7 + $0x28] sm:$0xff]  }
  0x16   :  { %390 = vmatprep.subr.bf16.mxu1 %v809_v27  ;;  %v839_v3 = vld [vmem:[%s1120_s7 + $0x70] sm:$0xff]   ;;  %v841_v5 = vld [vmem:[%s1120_s7 + $0x78] sm:$0xff]   ;;  %v435_v11 = vld [vmem:[%s1121_s6] sm:$0x3]  ;;  %v91_v15 = vsub.s32 0, %v90_v14 }
  0x17   :  { %350 = vmatpush1.bf16.msra.mxu0 %v772_v17  ;;  %v840_v4 = vld [vmem:[%s1120_s7 + $0x30] sm:$0xff]   ;;  %v842_v6 = vld [vmem:[%s1120_s7 + $0x38] sm:$0xff]   ;;  %v436_v13 = vadd.f32 1e-05, %v435_v11  ;;  %v87_v16 = vld [vmem:[%s1122_s2] sm:$0x3] }
  0x18   :  { %351 = vmatprep.subr.bf16.mxu0 %v773_v20  ;;  %v95_v17 = vsub.s32 1, %v90_v14  ;;  %v92_v18 = vrot.slane %v87_v16, %v91_v15  ;;  %v421_v19 = vld [vmem:[%s1123_s5] sm:$0x3] }
  0x19   :  { %391 = vmatpush1.bf16.msra.mxu1 %v813_v29  ;;  %843 = vrsqrt.f32 %v436_v13  ;;  %v451_v26 = vld [vmem:[%s1124_s3] sm:$0x3] }
  0x1a   :  { %392 = vmatprep.subr.bf16.mxu1 %v815_v31  ;;  %v96_v20 = vrot.slane %v87_v16, %v95_v17  ;;  %v465_v35 = vld [vmem:[%s1125_s4] sm:$0x3] }
  0x1b   :  { %352 = vmatpush1.bf16.msra.mxu0 %v775_v22  ;;  %v470_v41 = vrot.slane %v465_v35, %v91_v15 }
  0x1c   :  { %353 = vmatprep.subr.bf16.mxu0 %v776_v24  ;;  %v426_v24 = vrot.slane %v421_v19, %v91_v15 }
  0x1d   :  { %393 = vmatpush1.bf16.msra.mxu1 %v819_v37  ;;  %v456_v37 = vrot.slane %v451_v26, %v91_v15 }
  0x1e   :  { %394 = vmatprep.subr.bf16.mxu1 %v821_v38 }
  0x1f   :  { %354 = vmatpush1.bf16.msra.mxu0 %v778_v25 }
  0x20   :  { %355 = vmatprep.subr.bf16.mxu0 %v781_v28  ;;  %v430_v28 = vrot.slane %v421_v19, %v95_v17 }
  0x21   :  { %395 = vmatpush1.bf16.msra.mxu1 %v825_v39  ;;  %v460_v39 = vrot.slane %v451_v26, %v95_v17 }
  0x22   :  { %728 = vmatprep.subr.bf16.mxu1 %v827_v43  ;;  %v474_v43 = vrot.slane %v465_v35, %v95_v17 }
  0x23   :  { %356 = vmatpush1.bf16.msra.mxu0 %v784_v30  ;;  %v844_v21 = vpop.eup %843 }
  0x24   :  { %357 = vmatprep.subr.bf16.mxu0 %v787_v32  ;;  %413 = vmatmul.mubr.bf16.vlgmr.msra.gmra.mrb[0].mxu1 %v38_v46  ;;  %v442_v31 = vrot.slane %v844_v21, %v91_v15 }
  0x25   :  { %729 = vmatpush3.bf16.msra.mxu1 %v828_v44 }
  0x26   :  { %730 = vmatprep.subr.bf16.mxu1 %v829_v47 }
  0x27   :  { %358 = vmatpush1.bf16.msra.mxu0 %v790_v34  ;;  %v446_v34 = vrot.slane %v844_v21, %v95_v17 }
  0x28   :  { %359 = vmatprep.subr.bf16.mxu0 %v793_v36 }
  0x29   :  { %731 = vmatpush3.bf16.msra.mxu1 %v830_v49 }
  0x2a   :  { %732 = vmatprep.subr.bf16.mxu1 %v831_v51 }
  0x2b   :  { %360 = vmatpush1.bf16.msra.mxu0 %v796_v40 }
  0x2c   :  { %361 = vmatprep.subr.bf16.mxu0 %v799_v42 }
  0x2d   :  { %733 = vmatpush3.bf16.msra.mxu1 %v832_v53  ;;  %v711_v53 = vld [vmem:[%s1126_s8] ss:$0 sm:$0xff] }
  0x2e   :  { %734 = vmatprep.subr.bf16.mxu1 %v833_v61 }
  0x2f   :  { %362 = vmatpush1.bf16.msra.mxu0 %v802_v45 }
  0x30   :  { %363 = vmatprep.subr.bf16.mxu0 %v805_v48 }
  0x31   :  { %735 = vmatpush3.bf16.msra.mxu1 %v834_v62 }
  0x32   :  { %736 = vmatprep.subr.bf16.mxu1 %v835_v63 }
  0x33   :  { %364 = vmatpush1.bf16.msra.mxu0 %v808_v50 }
  0x34   :  { %365 = vmatprep.subr.bf16.mxu0 %v811_v52 }
  0x35   :  { %737 = vmatpush3.bf16.msra.mxu1 %v836_v0 }
  0x36   :  { %738 = vmatprep.subr.bf16.mxu1 %v837_v1 }
  0x37   :  { %366 = vmatpush1.bf16.msra.mxu0 %v814_v54 }
  0x38   :  { %367 = vmatprep.subr.bf16.mxu0 %v817_v55 }
  0x39   :  { %739 = vmatpush3.bf16.msra.mxu1 %v838_v2 }
  0x3a   :  { %740 = vmatprep.subr.bf16.mxu1 %v839_v3 }
  0x3b   :  { %368 = vmatpush1.bf16.msra.mxu0 %v820_v56 }
  0x3c   :  { %369 = vmatprep.subr.bf16.mxu0 %v823_v57 }
  0x3d   :  { %741 = vmatpush3.bf16.msra.mxu1 %v840_v4 }
  0x3e   :  { %742 = vmatprep.subr.bf16.mxu1 %v841_v5 }
  0x3f   :  { %370 = vmatpush1.bf16.msra.mxu0 %v826_v58 }
  0x41   :  { %743 = vmatpush3.bf16.msra.mxu1 %v842_v6 }
  0x42   :  { %372 = vmatmul.mubr.bf16.vlgmr.msra.gmra.mrb[0].mxu0 %v36_v60 }
  0xf7   :  { %v414_v7 = vpop.f32.mrb[0].mxu1 }
  0xf8   :  { %v416_v8 = vpop.f32.mrb[1].mxu1 }
  0xf9   :  { %v418_v9 = vpop.f32.mrb[2].mxu1 }
  0xfa   :  { %v419_v10 = vpop.f32.mrb[3].mxu1 }
 0x115   :  { %v373_v22 = vpop.f32.mrb[0].mxu0 }
 0x116   :  { %v374_v23 = vadd.f32 %v373_v22, %v92_v18  ;;  %v375_v25 = vpop.f32.mrb[1].mxu0 }
 0x117   :  { %v376_v27 = vadd.f32 %v375_v25, %v96_v20  ;;  %v377_v29 = vpop.f32.mrb[2].mxu0 }
 0x118   :  { %v415_v30 = vadd.f32 %v414_v7, %v374_v23  ;;  %v378_v32 = vpop.f32.mrb[3].mxu0 }
 0x119   :  { %v417_v33 = vadd.f32 %v416_v8, %v376_v27 }
 0x11a   :  { %v433_v36 = vsub.f32 %v415_v30, %v426_v24 }
 0x11b   :  { %v434_v38 = vsub.f32 %v417_v33, %v430_v28 }
 0x11c   :  { %v449_v40 = vmul.f32 %v442_v31, %v433_v36 }
 0x11d   :  { %v450_v42 = vmul.f32 %v446_v34, %v434_v38 }
 0x11e   :  { %v463_v44 = vmul.f32 %v456_v37, %v449_v40 }
 0x11f   :  { %v464_v45 = vmul.f32 %v460_v39, %v450_v42 }
 0x120   :  { %v477_v46 = vadd.f32 %v470_v41, %v463_v44 }
 0x121   :  { %v478_v47 = vadd.f32 %v474_v43, %v464_v45 }
 0x122   :  { %v479_v48 = vmax.f32 %v477_v46, 0.0 }
 0x123   :  { %v480_v49 = vmax.f32 %v478_v47, 0.0 }
 0x124   :  { %v481_v51 = vpack.c.bf16 %v479_v48, %v479_v48 }
 0x125   :  { %v482_v50 = vpack.c.bf16 %v480_v49, %v480_v49 }
 0x127   :  { %650 = vmatprep.mubr.bf16.mxu1 %v482_v50 }
 0x128   :  { %651 = vmatmul.mubr.bf16.vlgmr.msra.gmra.mrb[4].mxu1 %v481_v51 }
 0x1fb   :  { %v744_v52 = vpop.f32.mrb[4].mxu1 }
 0x1fc   :  { %v745_v54 = vpop.f32.mrb[5].mxu1 }
 0x1fd   :  { %v746_v55 = vadd.f32 %v745_v54, %v744_v52  ;;  %v747_v56 = vpop.f32.mrb[6].mxu1 }
 0x1fe   :  { %v748_v57 = vpop.f32.mrb[7].mxu1 }
 0x1ff   :  { %v653_v58 = vadd.f32 %v746_v55, %v711_v53 }
 0x201   :  { %658 = vst [vmem:[%s1127_s9] sm:$0xff] %v653_v58 }

</bundles_post_ra>
